<compile_context>
chip_gen: v7x
topology: tpu7x:2x2x1
jax: 0.10.0
libtpu: 0.0.40
codegen_flags: <defaults>
</compile_context>

<pallas_src>
import jax
import jax.numpy as jnp
from jax.experimental import pallas as pl
from jax.experimental.pallas import tpu as pltpu


def icu_lstm_kernel(xw_ref, wf_ref, b1_ref, wfc_ref, bfc_ref, out_ref):
    seq, Bt, G = xw_ref.shape          # time-major hoisted projection (seq, Bt, 4*Hp)
    Hp = G // 4                        # packed (lightly padded) hidden width
    O = wfc_ref.shape[0]

    # sigmoid(x) = 0.5*tanh(0.5*x) + 0.5  -> one EUP op instead of exp + reciprocal.
    def sig(v):
        return 0.5 * jnp.tanh(0.5 * v) + 0.5

    def lstm_gates(gates, c):
        # PyTorch gate order i, f, g, o, packed contiguously (Hp lanes each).
        i_g = sig(gates[:, 0 * Hp:1 * Hp])
        f_g = sig(gates[:, 1 * Hp:2 * Hp])
        g_g = jnp.tanh(gates[:, 2 * Hp:3 * Hp])
        o_g = sig(gates[:, 3 * Hp:4 * Hp])
        c_new = f_g * c + i_g * g_g
        h_new = o_g * jnp.tanh(c_new)
        return h_new, c_new

    # Hoisted out of the time loop: resident weight load + bias broadcast.
    wf = wf_ref[...]                                   # (2Hp, 2G) bf16, fused block matrix
    b1 = jnp.broadcast_to(b1_ref[...], (Bt, G))        # layer-1 bias

    zeros_h = jnp.zeros((Bt, Hp), jnp.float32)
    zeros_g = jnp.zeros((Bt, G), jnp.float32)

    def step(t, carry):
        h1, c0, c1, r0 = carry
        # Layer-0 gates at t: hoisted input projection + recurrent term (made at step t-1).
        g0 = xw_ref[t] + r0
        h0, c0 = lstm_gates(g0, c0)
        # One fused MXU push per step:
        #   [h0(t) | h1(t-1)] @ [[Whh0^T, Wih1^T], [0, Whh1^T]]
        #     [:, :G] -> layer-0 recurrent term for step t+1
        #     [:, G:] -> layer-1 pre-bias gates for step t
        hin = jnp.concatenate([h0, h1], axis=-1).astype(jnp.bfloat16)
        fused = jnp.dot(hin, wf, preferred_element_type=jnp.float32)
        r0 = fused[:, :G]
        g1 = fused[:, G:] + b1
        h1, c1 = lstm_gates(g1, c1)
        return h1, c0, c1, r0

    carry = (zeros_h, zeros_h, zeros_h, zeros_g)
    if seq <= 32:
        # Static full unroll: all indices/slices are compile-time constants.
        for t in range(seq):
            carry = step(t, carry)
    else:
        # Bounded unroll keeps code size / live ranges in check for long sequences.
        carry = jax.lax.fori_loop(0, seq, step, carry, unroll=4)
    h1 = carry[0]

    # fc(out[-1]) + sigmoid: O is tiny -> VPU/XLU lane reduction, no MXU push.
    wfc = wfc_ref[...]                                  # (O, Hp) f32, zero-padded cols
    cols = [jnp.sum(h1 * wfc[o:o + 1, :], axis=-1, keepdims=True) for o in range(O)]
    logits = cols[0] if O == 1 else jnp.concatenate(cols, axis=-1)
    out_ref[...] = sig(logits + bfc_ref[...])


def _round_up(v, m):
    return (v + m - 1) // m * m


def init_params(key, input_dim, hidden_dim, output_dim=1):
    """Deterministic parameter init matching the PyTorch shapes."""
    H = hidden_dim
    ks = jax.random.split(key, 10)
    bound = 1.0 / jnp.sqrt(H)

    def u(k, shape):
        return jax.random.uniform(k, shape, jnp.float32, -bound, bound)

    return {
        # layer 0
        "w_ih_l0": u(ks[0], (4 * H, input_dim)),
        "w_hh_l0": u(ks[1], (4 * H, H)),
        "b_ih_l0": u(ks[2], (4 * H,)),
        "b_hh_l0": u(ks[3], (4 * H,)),
        # layer 1
        "w_ih_l1": u(ks[4], (4 * H, H)),
        "w_hh_l1": u(ks[5], (4 * H, H)),
        "b_ih_l1": u(ks[6], (4 * H,)),
        "b_hh_l1": u(ks[7], (4 * H,)),
        # fc
        "w_fc": u(ks[8], (output_dim, H)),
        "b_fc": u(ks[9], (output_dim,)),
    }


def icu_model_forward(x, params):
    """x: (batch, seq, input_dim) float32 -> (batch, output_dim) probabilities."""
    x = x.astype(jnp.float32)
    B, seq, D = x.shape
    H = params["w_hh_l0"].shape[1]
    O = params["w_fc"].shape[0]

    # Packed gate layout: Hp only rounds H up to a multiple of 32 so G = 4*Hp is a
    # 128-lane multiple.  (For H = 32 the whole gate block is exactly one lane vreg.)
    # Zero padding on the extra lanes is exact: h/c padded lanes stay identically 0.
    Hp = _round_up(H, 32)
    G = 4 * Hp

    def pad_gate_cols(w):          # (K, 4H) -> (K, G): per-gate zero pad (no-op if Hp==H)
        if Hp == H:
            return w
        blocks = [jnp.pad(w[:, g * H:(g + 1) * H], ((0, 0), (0, Hp - H)))
                  for g in range(4)]
        return jnp.concatenate(blocks, axis=1)

    def pad_rows(w):               # (H, G) -> (Hp, G)
        return jnp.pad(w, ((0, Hp - w.shape[0]), (0, 0)))

    # ---- Hoisted layer-0 input projection (off the serial path): plain XLA matmul -------
    wih0 = pad_gate_cols(params["w_ih_l0"].T)                                    # (D, G)
    b0 = pad_gate_cols((params["b_ih_l0"] + params["b_hh_l0"])[None, :])         # (1, G)
    xw = jnp.einsum("bsd,dg->sbg", x, wih0) + b0                                 # (seq, B, G)

    # ---- Fused recurrent weight [[Whh0^T, Wih1^T],[0, Whh1^T]] -> one dot per step ------
    whh0 = pad_rows(pad_gate_cols(params["w_hh_l0"].T))                          # (Hp, G)
    wih1 = pad_rows(pad_gate_cols(params["w_ih_l1"].T))                          # (Hp, G)
    whh1 = pad_rows(pad_gate_cols(params["w_hh_l1"].T))                          # (Hp, G)
    w_fused = jnp.concatenate(
        [jnp.concatenate([whh0, wih1], axis=1),
         jnp.concatenate([jnp.zeros_like(whh1), whh1], axis=1)],
        axis=0).astype(jnp.bfloat16)                                             # (2Hp, 2G)

    b1 = pad_gate_cols((params["b_ih_l1"] + params["b_hh_l1"])[None, :])         # (1, G)
    wfc = jnp.pad(params["w_fc"], ((0, 0), (0, Hp - H))).astype(jnp.float32)     # (O, Hp)
    bfc = params["b_fc"][None, :].astype(jnp.float32)                            # (1, O)

    # ---- Batch tiling: full sublanes, >= 2 tiles when B > 8 (v7x megacore), cap 128 -----
    if B <= 8:
        Bt = 8
    else:
        Bt = min(128, _round_up((B + 1) // 2, 8))
    B_pad = _round_up(B, Bt)
    if B_pad != B:
        xw = jnp.pad(xw, ((0, 0), (0, B_pad - B), (0, 0)))

    # Explicit VMEM budget: double-buffered xw block + resident weights + headroom.
    xw_blk_bytes = seq * Bt * G * 4
    w_bytes = (2 * Hp) * (2 * G) * 2 + 2 * G * 4 + O * Hp * 4 + O * 4
    vmem_limit = int(min(64 << 20, max(32 << 20, 2 * (xw_blk_bytes + w_bytes) + (4 << 20))))

    out = pl.pallas_call(
        icu_lstm_kernel,
        out_shape=jax.ShapeDtypeStruct((B_pad, O), jnp.float32),
        grid_spec=pltpu.PrefetchScalarGridSpec(
            num_scalar_prefetch=0,
            grid=(B_pad // Bt,),
            in_specs=[
                pl.BlockSpec((seq, Bt, G), lambda i: (0, i, 0)),     # xw: batch-tiled
                # Weights/biases: constant index_maps -> stay resident across grid steps.
                # (pipeline_mode=pl.Buffered(1) would drop the second buffer copy; at this
                #  H the saving is negligible, so defaults are kept for robustness.)
                pl.BlockSpec((2 * Hp, 2 * G), lambda i: (0, 0)),
                pl.BlockSpec((1, G), lambda i: (0, 0)),
                pl.BlockSpec((O, Hp), lambda i: (0, 0)),
                pl.BlockSpec((1, O), lambda i: (0, 0)),
            ],
            out_specs=pl.BlockSpec((Bt, O), lambda i: (i, 0)),
        ),
        compiler_params=pltpu.CompilerParams(
            dimension_semantics=("parallel",),
            vmem_limit_bytes=vmem_limit,
        ),
    )(xw, w_fused, b1, wfc, bfc)
    return out[:B]


def icu_model_reference(x, params):
    """Pure-JAX f32 reference replicating torch.nn.LSTM(2 layers) + Linear + Sigmoid."""
    x_tm = jnp.transpose(x, (1, 0, 2)).astype(jnp.float32)
    seq, B, _ = x_tm.shape
    H = params["w_hh_l0"].shape[1]

    def cell(x_t, h, c, wih, whh, bih, bhh):
        gates = x_t @ wih.T + bih + h @ whh.T + bhh
        i = jax.nn.sigmoid(gates[:, 0 * H:1 * H])
        f = jax.nn.sigmoid(gates[:, 1 * H:2 * H])
        g = jnp.tanh(gates[:, 2 * H:3 * H])
        o = jax.nn.sigmoid(gates[:, 3 * H:4 * H])
        c = f * c + i * g
        h = o * jnp.tanh(c)
        return h, c

    h0 = c0 = h1 = c1 = jnp.zeros((B, H), jnp.float32)
    for t in range(seq):
        h0, c0 = cell(x_tm[t], h0, c0, params["w_ih_l0"], params["w_hh_l0"],
                      params["b_ih_l0"], params["b_hh_l0"])
        h1, c1 = cell(h0, h1, c1, params["w_ih_l1"], params["w_hh_l1"],
                      params["b_ih_l1"], params["b_hh_l1"])
    return jax.nn.sigmoid(h1 @ params["w_fc"].T + params["b_fc"])


if __name__ == "__main__":
    batch, seq, input_dim, hidden_dim, output_dim = 2, 8, 4, 32, 1

    key = jax.random.PRNGKey(0)
    k_x, k_p = jax.random.split(key)
    x = jax.random.normal(k_x, (batch, seq, input_dim), jnp.float32)
    params = init_params(k_p, input_dim, hidden_dim, output_dim)

    out = icu_model_forward(x, params)
    jax.block_until_ready(out)

    ref = icu_model_reference(x, params)
    assert out.shape == (batch, output_dim)
    # bf16 MXU operands (f32 accumulate) compound a little rounding over the recurrence.
    assert jnp.allclose(out, ref, atol=2e-2, rtol=2e-2), (out, ref)

    print("KERNEL_OK")
</pallas_src>

<mosaic_0001>
module attributes {stable_mosaic.version = 11 : i64} {
  func.func @icu_lstm_kernel(%arg0: i32, %arg1: memref<8x8x128xf32, #tpu.memory_space<vmem>>, %arg2: memref<64x256xbf16, #tpu.memory_space<vmem>>, %arg3: memref<1x128xf32, #tpu.memory_space<vmem>>, %arg4: memref<1x32xf32, #tpu.memory_space<vmem>>, %arg5: memref<1x1xf32, #tpu.memory_space<vmem>>, %arg6: memref<8x1xf32, #tpu.memory_space<vmem>>) attributes {dimension_semantics = [#tpu.dimension_semantics<parallel>], iteration_bounds = array<i64: 1>, scalar_prefetch = 0 : i64, scratch_operands = 0 : i64, tpu.core_type = #tpu.core_type<tc>, window_params = [{transform_indices = @transform_0, window_bounds = array<i64: 8, 8, 128>}, {pipeline_mode = #tpu.pipeline_mode<synchronous>, transform_indices = @transform_1, window_bounds = array<i64: 64, 256>}, {pipeline_mode = #tpu.pipeline_mode<synchronous>, transform_indices = @transform_2, window_bounds = array<i64: 1, 128>}, {pipeline_mode = #tpu.pipeline_mode<synchronous>, transform_indices = @transform_3, window_bounds = array<i64: 1, 32>}, {pipeline_mode = #tpu.pipeline_mode<synchronous>, transform_indices = @transform_4, window_bounds = array<i64: 1, 1>}, {transform_indices = @transform_5, window_bounds = array<i64: 8, 1>}]} {
    %c0 = arith.constant 0 : index
    %c0_0 = arith.constant 0 : index
    %0 = vector.load %arg2[%c0, %c0_0] : memref<64x256xbf16, #tpu.memory_space<vmem>>, vector<64x256xbf16>
    %c0_1 = arith.constant 0 : index
    %c0_2 = arith.constant 0 : index
    %1 = vector.load %arg3[%c0_1, %c0_2] : memref<1x128xf32, #tpu.memory_space<vmem>>, vector<1x128xf32>
    %2 = vector.shape_cast %1 : vector<1x128xf32> to vector<1x128xf32>
    %3 = vector.broadcast %2 : vector<1x128xf32> to vector<8x128xf32>
    %cst = arith.constant 0.000000e+00 : f32
    %4 = vector.broadcast %cst : f32 to vector<8x32xf32>
    %cst_3 = arith.constant 0.000000e+00 : f32
    %5 = vector.broadcast %cst_3 : f32 to vector<8x128xf32>
    %c0_4 = arith.constant 0 : index
    %c0_5 = arith.constant 0 : index
    %c0_6 = arith.constant 0 : index
    %6 = vector.load %arg1[%c0_4, %c0_5, %c0_6] : memref<8x8x128xf32, #tpu.memory_space<vmem>>, vector<1x8x128xf32>
    %7 = vector.shape_cast %6 : vector<1x8x128xf32> to vector<8x128xf32>
    %8 = arith.addf %7, %5 : vector<8x128xf32>
    %9 = vector.extract_strided_slice %8 {offsets = [0, 0], sizes = [8, 32], strides = [1, 1]} : vector<8x128xf32> to vector<8x32xf32>
    %cst_7 = arith.constant 5.000000e-01 : f32
    %10 = vector.broadcast %cst_7 : f32 to vector<8x32xf32>
    %11 = arith.mulf %10, %9 : vector<8x32xf32>
    %12 = math.tanh %11 : vector<8x32xf32>
    %cst_8 = arith.constant 5.000000e-01 : f32
    %13 = vector.broadcast %cst_8 : f32 to vector<8x32xf32>
    %14 = arith.mulf %13, %12 : vector<8x32xf32>
    %cst_9 = arith.constant 5.000000e-01 : f32
    %15 = vector.broadcast %cst_9 : f32 to vector<8x32xf32>
    %16 = arith.addf %14, %15 : vector<8x32xf32>
    %17 = vector.extract_strided_slice %8 {offsets = [0, 32], sizes = [8, 32], strides = [1, 1]} : vector<8x128xf32> to vector<8x32xf32>
    %cst_10 = arith.constant 5.000000e-01 : f32
    %18 = vector.broadcast %cst_10 : f32 to vector<8x32xf32>
    %19 = arith.mulf %18, %17 : vector<8x32xf32>
    %20 = math.tanh %19 : vector<8x32xf32>
    %cst_11 = arith.constant 5.000000e-01 : f32
    %21 = vector.broadcast %cst_11 : f32 to vector<8x32xf32>
    %22 = arith.mulf %21, %20 : vector<8x32xf32>
    %cst_12 = arith.constant 5.000000e-01 : f32
    %23 = vector.broadcast %cst_12 : f32 to vector<8x32xf32>
    %24 = arith.addf %22, %23 : vector<8x32xf32>
    %25 = vector.extract_strided_slice %8 {offsets = [0, 64], sizes = [8, 32], strides = [1, 1]} : vector<8x128xf32> to vector<8x32xf32>
    %26 = math.tanh %25 : vector<8x32xf32>
    %27 = vector.extract_strided_slice %8 {offsets = [0, 96], sizes = [8, 32], strides = [1, 1]} : vector<8x128xf32> to vector<8x32xf32>
    %cst_13 = arith.constant 5.000000e-01 : f32
    %28 = vector.broadcast %cst_13 : f32 to vector<8x32xf32>
    %29 = arith.mulf %28, %27 : vector<8x32xf32>
    %30 = math.tanh %29 : vector<8x32xf32>
    %cst_14 = arith.constant 5.000000e-01 : f32
    %31 = vector.broadcast %cst_14 : f32 to vector<8x32xf32>
    %32 = arith.mulf %31, %30 : vector<8x32xf32>
    %cst_15 = arith.constant 5.000000e-01 : f32
    %33 = vector.broadcast %cst_15 : f32 to vector<8x32xf32>
    %34 = arith.addf %32, %33 : vector<8x32xf32>
    %35 = arith.mulf %24, %4 : vector<8x32xf32>
    %36 = arith.mulf %16, %26 : vector<8x32xf32>
    %37 = arith.addf %35, %36 : vector<8x32xf32>
    %38 = math.tanh %37 : vector<8x32xf32>
    %39 = arith.mulf %34, %38 : vector<8x32xf32>
    %40 = tpu.concatenate %39, %4 in 1 : vector<8x32xf32>, vector<8x32xf32> -> vector<8x64xf32>
    %41 = arith.truncf %40 : vector<8x64xf32> to vector<8x64xbf16>
    %cst_16 = arith.constant dense<0.000000e+00> : vector<8x256xf32>
    %42 = tpu.matmul %41, %0, %cst_16 {dimension_numbers = #tpu.dot_dimension_numbers<[1], [0], [0], [1], [0, 0, 1, 1], [], []>} : vector<8x64xbf16>, vector<64x256xbf16>, vector<8x256xf32> -> vector<8x256xf32>
    %43 = vector.extract_strided_slice %42 {offsets = [0, 0], sizes = [8, 128], strides = [1, 1]} : vector<8x256xf32> to vector<8x128xf32>
    %44 = vector.extract_strided_slice %42 {offsets = [0, 128], sizes = [8, 128], strides = [1, 1]} : vector<8x256xf32> to vector<8x128xf32>
    %45 = arith.addf %44, %3 : vector<8x128xf32>
    %46 = vector.extract_strided_slice %45 {offsets = [0, 0], sizes = [8, 32], strides = [1, 1]} : vector<8x128xf32> to vector<8x32xf32>
    %cst_17 = arith.constant 5.000000e-01 : f32
    %47 = vector.broadcast %cst_17 : f32 to vector<8x32xf32>
    %48 = arith.mulf %47, %46 : vector<8x32xf32>
    %49 = math.tanh %48 : vector<8x32xf32>
    %cst_18 = arith.constant 5.000000e-01 : f32
    %50 = vector.broadcast %cst_18 : f32 to vector<8x32xf32>
    %51 = arith.mulf %50, %49 : vector<8x32xf32>
    %cst_19 = arith.constant 5.000000e-01 : f32
    %52 = vector.broadcast %cst_19 : f32 to vector<8x32xf32>
    %53 = arith.addf %51, %52 : vector<8x32xf32>
    %54 = vector.extract_strided_slice %45 {offsets = [0, 32], sizes = [8, 32], strides = [1, 1]} : vector<8x128xf32> to vector<8x32xf32>
    %cst_20 = arith.constant 5.000000e-01 : f32
    %55 = vector.broadcast %cst_20 : f32 to vector<8x32xf32>
    %56 = arith.mulf %55, %54 : vector<8x32xf32>
    %57 = math.tanh %56 : vector<8x32xf32>
    %cst_21 = arith.constant 5.000000e-01 : f32
    %58 = vector.broadcast %cst_21 : f32 to vector<8x32xf32>
    %59 = arith.mulf %58, %57 : vector<8x32xf32>
    %cst_22 = arith.constant 5.000000e-01 : f32
    %60 = vector.broadcast %cst_22 : f32 to vector<8x32xf32>
    %61 = arith.addf %59, %60 : vector<8x32xf32>
    %62 = vector.extract_strided_slice %45 {offsets = [0, 64], sizes = [8, 32], strides = [1, 1]} : vector<8x128xf32> to vector<8x32xf32>
    %63 = math.tanh %62 : vector<8x32xf32>
    %64 = vector.extract_strided_slice %45 {offsets = [0, 96], sizes = [8, 32], strides = [1, 1]} : vector<8x128xf32> to vector<8x32xf32>
    %cst_23 = arith.constant 5.000000e-01 : f32
    %65 = vector.broadcast %cst_23 : f32 to vector<8x32xf32>
    %66 = arith.mulf %65, %64 : vector<8x32xf32>
    %67 = math.tanh %66 : vector<8x32xf32>
    %cst_24 = arith.constant 5.000000e-01 : f32
    %68 = vector.broadcast %cst_24 : f32 to vector<8x32xf32>
    %69 = arith.mulf %68, %67 : vector<8x32xf32>
    %cst_25 = arith.constant 5.000000e-01 : f32
    %70 = vector.broadcast %cst_25 : f32 to vector<8x32xf32>
    %71 = arith.addf %69, %70 : vector<8x32xf32>
    %72 = arith.mulf %61, %4 : vector<8x32xf32>
    %73 = arith.mulf %53, %63 : vector<8x32xf32>
    %74 = arith.addf %72, %73 : vector<8x32xf32>
    %75 = math.tanh %74 : vector<8x32xf32>
    %76 = arith.mulf %71, %75 : vector<8x32xf32>
    %c1 = arith.constant 1 : index
    %c0_26 = arith.constant 0 : index
    %c0_27 = arith.constant 0 : index
    %77 = vector.load %arg1[%c1, %c0_26, %c0_27] : memref<8x8x128xf32, #tpu.memory_space<vmem>>, vector<1x8x128xf32>
    %78 = vector.shape_cast %77 : vector<1x8x128xf32> to vector<8x128xf32>
    %79 = arith.addf %78, %43 : vector<8x128xf32>
    %80 = vector.extract_strided_slice %79 {offsets = [0, 0], sizes = [8, 32], strides = [1, 1]} : vector<8x128xf32> to vector<8x32xf32>
    %cst_28 = arith.constant 5.000000e-01 : f32
    %81 = vector.broadcast %cst_28 : f32 to vector<8x32xf32>
    %82 = arith.mulf %81, %80 : vector<8x32xf32>
    %83 = math.tanh %82 : vector<8x32xf32>
    %cst_29 = arith.constant 5.000000e-01 : f32
    %84 = vector.broadcast %cst_29 : f32 to vector<8x32xf32>
    %85 = arith.mulf %84, %83 : vector<8x32xf32>
    %cst_30 = arith.constant 5.000000e-01 : f32
    %86 = vector.broadcast %cst_30 : f32 to vector<8x32xf32>
    %87 = arith.addf %85, %86 : vector<8x32xf32>
    %88 = vector.extract_strided_slice %79 {offsets = [0, 32], sizes = [8, 32], strides = [1, 1]} : vector<8x128xf32> to vector<8x32xf32>
    %cst_31 = arith.constant 5.000000e-01 : f32
    %89 = vector.broadcast %cst_31 : f32 to vector<8x32xf32>
    %90 = arith.mulf %89, %88 : vector<8x32xf32>
    %91 = math.tanh %90 : vector<8x32xf32>
    %cst_32 = arith.constant 5.000000e-01 : f32
    %92 = vector.broadcast %cst_32 : f32 to vector<8x32xf32>
    %93 = arith.mulf %92, %91 : vector<8x32xf32>
    %cst_33 = arith.constant 5.000000e-01 : f32
    %94 = vector.broadcast %cst_33 : f32 to vector<8x32xf32>
    %95 = arith.addf %93, %94 : vector<8x32xf32>
    %96 = vector.extract_strided_slice %79 {offsets = [0, 64], sizes = [8, 32], strides = [1, 1]} : vector<8x128xf32> to vector<8x32xf32>
    %97 = math.tanh %96 : vector<8x32xf32>
    %98 = vector.extract_strided_slice %79 {offsets = [0, 96], sizes = [8, 32], strides = [1, 1]} : vector<8x128xf32> to vector<8x32xf32>
    %cst_34 = arith.constant 5.000000e-01 : f32
    %99 = vector.broadcast %cst_34 : f32 to vector<8x32xf32>
    %100 = arith.mulf %99, %98 : vector<8x32xf32>
    %101 = math.tanh %100 : vector<8x32xf32>
    %cst_35 = arith.constant 5.000000e-01 : f32
    %102 = vector.broadcast %cst_35 : f32 to vector<8x32xf32>
    %103 = arith.mulf %102, %101 : vector<8x32xf32>
    %cst_36 = arith.constant 5.000000e-01 : f32
    %104 = vector.broadcast %cst_36 : f32 to vector<8x32xf32>
    %105 = arith.addf %103, %104 : vector<8x32xf32>
    %106 = arith.mulf %95, %37 : vector<8x32xf32>
    %107 = arith.mulf %87, %97 : vector<8x32xf32>
    %108 = arith.addf %106, %107 : vector<8x32xf32>
    %109 = math.tanh %108 : vector<8x32xf32>
    %110 = arith.mulf %105, %109 : vector<8x32xf32>
    %111 = tpu.concatenate %110, %76 in 1 : vector<8x32xf32>, vector<8x32xf32> -> vector<8x64xf32>
    %112 = arith.truncf %111 : vector<8x64xf32> to vector<8x64xbf16>
    %cst_37 = arith.constant dense<0.000000e+00> : vector<8x256xf32>
    %113 = tpu.matmul %112, %0, %cst_37 {dimension_numbers = #tpu.dot_dimension_numbers<[1], [0], [0], [1], [0, 0, 1, 1], [], []>} : vector<8x64xbf16>, vector<64x256xbf16>, vector<8x256xf32> -> vector<8x256xf32>
    %114 = vector.extract_strided_slice %113 {offsets = [0, 0], sizes = [8, 128], strides = [1, 1]} : vector<8x256xf32> to vector<8x128xf32>
    %115 = vector.extract_strided_slice %113 {offsets = [0, 128], sizes = [8, 128], strides = [1, 1]} : vector<8x256xf32> to vector<8x128xf32>
    %116 = arith.addf %115, %3 : vector<8x128xf32>
    %117 = vector.extract_strided_slice %116 {offsets = [0, 0], sizes = [8, 32], strides = [1, 1]} : vector<8x128xf32> to vector<8x32xf32>
    %cst_38 = arith.constant 5.000000e-01 : f32
    %118 = vector.broadcast %cst_38 : f32 to vector<8x32xf32>
    %119 = arith.mulf %118, %117 : vector<8x32xf32>
    %120 = math.tanh %119 : vector<8x32xf32>
    %cst_39 = arith.constant 5.000000e-01 : f32
    %121 = vector.broadcast %cst_39 : f32 to vector<8x32xf32>
    %122 = arith.mulf %121, %120 : vector<8x32xf32>
    %cst_40 = arith.constant 5.000000e-01 : f32
    %123 = vector.broadcast %cst_40 : f32 to vector<8x32xf32>
    %124 = arith.addf %122, %123 : vector<8x32xf32>
    %125 = vector.extract_strided_slice %116 {offsets = [0, 32], sizes = [8, 32], strides = [1, 1]} : vector<8x128xf32> to vector<8x32xf32>
    %cst_41 = arith.constant 5.000000e-01 : f32
    %126 = vector.broadcast %cst_41 : f32 to vector<8x32xf32>
    %127 = arith.mulf %126, %125 : vector<8x32xf32>
    %128 = math.tanh %127 : vector<8x32xf32>
    %cst_42 = arith.constant 5.000000e-01 : f32
    %129 = vector.broadcast %cst_42 : f32 to vector<8x32xf32>
    %130 = arith.mulf %129, %128 : vector<8x32xf32>
    %cst_43 = arith.constant 5.000000e-01 : f32
    %131 = vector.broadcast %cst_43 : f32 to vector<8x32xf32>
    %132 = arith.addf %130, %131 : vector<8x32xf32>
    %133 = vector.extract_strided_slice %116 {offsets = [0, 64], sizes = [8, 32], strides = [1, 1]} : vector<8x128xf32> to vector<8x32xf32>
    %134 = math.tanh %133 : vector<8x32xf32>
    %135 = vector.extract_strided_slice %116 {offsets = [0, 96], sizes = [8, 32], strides = [1, 1]} : vector<8x128xf32> to vector<8x32xf32>
    %cst_44 = arith.constant 5.000000e-01 : f32
    %136 = vector.broadcast %cst_44 : f32 to vector<8x32xf32>
    %137 = arith.mulf %136, %135 : vector<8x32xf32>
    %138 = math.tanh %137 : vector<8x32xf32>
    %cst_45 = arith.constant 5.000000e-01 : f32
    %139 = vector.broadcast %cst_45 : f32 to vector<8x32xf32>
    %140 = arith.mulf %139, %138 : vector<8x32xf32>
    %cst_46 = arith.constant 5.000000e-01 : f32
    %141 = vector.broadcast %cst_46 : f32 to vector<8x32xf32>
    %142 = arith.addf %140, %141 : vector<8x32xf32>
    %143 = arith.mulf %132, %74 : vector<8x32xf32>
    %144 = arith.mulf %124, %134 : vector<8x32xf32>
    %145 = arith.addf %143, %144 : vector<8x32xf32>
    %146 = math.tanh %145 : vector<8x32xf32>
    %147 = arith.mulf %142, %146 : vector<8x32xf32>
    %c2 = arith.constant 2 : index
    %c0_47 = arith.constant 0 : index
    %c0_48 = arith.constant 0 : index
    %148 = vector.load %arg1[%c2, %c0_47, %c0_48] : memref<8x8x128xf32, #tpu.memory_space<vmem>>, vector<1x8x128xf32>
    %149 = vector.shape_cast %148 : vector<1x8x128xf32> to vector<8x128xf32>
    %150 = arith.addf %149, %114 : vector<8x128xf32>
    %151 = vector.extract_strided_slice %150 {offsets = [0, 0], sizes = [8, 32], strides = [1, 1]} : vector<8x128xf32> to vector<8x32xf32>
    %cst_49 = arith.constant 5.000000e-01 : f32
    %152 = vector.broadcast %cst_49 : f32 to vector<8x32xf32>
    %153 = arith.mulf %152, %151 : vector<8x32xf32>
    %154 = math.tanh %153 : vector<8x32xf32>
    %cst_50 = arith.constant 5.000000e-01 : f32
    %155 = vector.broadcast %cst_50 : f32 to vector<8x32xf32>
    %156 = arith.mulf %155, %154 : vector<8x32xf32>
    %cst_51 = arith.constant 5.000000e-01 : f32
    %157 = vector.broadcast %cst_51 : f32 to vector<8x32xf32>
    %158 = arith.addf %156, %157 : vector<8x32xf32>
    %159 = vector.extract_strided_slice %150 {offsets = [0, 32], sizes = [8, 32], strides = [1, 1]} : vector<8x128xf32> to vector<8x32xf32>
    %cst_52 = arith.constant 5.000000e-01 : f32
    %160 = vector.broadcast %cst_52 : f32 to vector<8x32xf32>
    %161 = arith.mulf %160, %159 : vector<8x32xf32>
    %162 = math.tanh %161 : vector<8x32xf32>
    %cst_53 = arith.constant 5.000000e-01 : f32
    %163 = vector.broadcast %cst_53 : f32 to vector<8x32xf32>
    %164 = arith.mulf %163, %162 : vector<8x32xf32>
    %cst_54 = arith.constant 5.000000e-01 : f32
    %165 = vector.broadcast %cst_54 : f32 to vector<8x32xf32>
    %166 = arith.addf %164, %165 : vector<8x32xf32>
    %167 = vector.extract_strided_slice %150 {offsets = [0, 64], sizes = [8, 32], strides = [1, 1]} : vector<8x128xf32> to vector<8x32xf32>
    %168 = math.tanh %167 : vector<8x32xf32>
    %169 = vector.extract_strided_slice %150 {offsets = [0, 96], sizes = [8, 32], strides = [1, 1]} : vector<8x128xf32> to vector<8x32xf32>
    %cst_55 = arith.constant 5.000000e-01 : f32
    %170 = vector.broadcast %cst_55 : f32 to vector<8x32xf32>
    %171 = arith.mulf %170, %169 : vector<8x32xf32>
    %172 = math.tanh %171 : vector<8x32xf32>
    %cst_56 = arith.constant 5.000000e-01 : f32
    %173 = vector.broadcast %cst_56 : f32 to vector<8x32xf32>
    %174 = arith.mulf %173, %172 : vector<8x32xf32>
    %cst_57 = arith.constant 5.000000e-01 : f32
    %175 = vector.broadcast %cst_57 : f32 to vector<8x32xf32>
    %176 = arith.addf %174, %175 : vector<8x32xf32>
    %177 = arith.mulf %166, %108 : vector<8x32xf32>
    %178 = arith.mulf %158, %168 : vector<8x32xf32>
    %179 = arith.addf %177, %178 : vector<8x32xf32>
    %180 = math.tanh %179 : vector<8x32xf32>
    %181 = arith.mulf %176, %180 : vector<8x32xf32>
    %182 = tpu.concatenate %181, %147 in 1 : vector<8x32xf32>, vector<8x32xf32> -> vector<8x64xf32>
    %183 = arith.truncf %182 : vector<8x64xf32> to vector<8x64xbf16>
    %cst_58 = arith.constant dense<0.000000e+00> : vector<8x256xf32>
    %184 = tpu.matmul %183, %0, %cst_58 {dimension_numbers = #tpu.dot_dimension_numbers<[1], [0], [0], [1], [0, 0, 1, 1], [], []>} : vector<8x64xbf16>, vector<64x256xbf16>, vector<8x256xf32> -> vector<8x256xf32>
    %185 = vector.extract_strided_slice %184 {offsets = [0, 0], sizes = [8, 128], strides = [1, 1]} : vector<8x256xf32> to vector<8x128xf32>
    %186 = vector.extract_strided_slice %184 {offsets = [0, 128], sizes = [8, 128], strides = [1, 1]} : vector<8x256xf32> to vector<8x128xf32>
    %187 = arith.addf %186, %3 : vector<8x128xf32>
    %188 = vector.extract_strided_slice %187 {offsets = [0, 0], sizes = [8, 32], strides = [1, 1]} : vector<8x128xf32> to vector<8x32xf32>
    %cst_59 = arith.constant 5.000000e-01 : f32
    %189 = vector.broadcast %cst_59 : f32 to vector<8x32xf32>
    %190 = arith.mulf %189, %188 : vector<8x32xf32>
    %191 = math.tanh %190 : vector<8x32xf32>
    %cst_60 = arith.constant 5.000000e-01 : f32
    %192 = vector.broadcast %cst_60 : f32 to vector<8x32xf32>
    %193 = arith.mulf %192, %191 : vector<8x32xf32>
    %cst_61 = arith.constant 5.000000e-01 : f32
    %194 = vector.broadcast %cst_61 : f32 to vector<8x32xf32>
    %195 = arith.addf %193, %194 : vector<8x32xf32>
    %196 = vector.extract_strided_slice %187 {offsets = [0, 32], sizes = [8, 32], strides = [1, 1]} : vector<8x128xf32> to vector<8x32xf32>
    %cst_62 = arith.constant 5.000000e-01 : f32
    %197 = vector.broadcast %cst_62 : f32 to vector<8x32xf32>
    %198 = arith.mulf %197, %196 : vector<8x32xf32>
    %199 = math.tanh %198 : vector<8x32xf32>
    %cst_63 = arith.constant 5.000000e-01 : f32
    %200 = vector.broadcast %cst_63 : f32 to vector<8x32xf32>
    %201 = arith.mulf %200, %199 : vector<8x32xf32>
    %cst_64 = arith.constant 5.000000e-01 : f32
    %202 = vector.broadcast %cst_64 : f32 to vector<8x32xf32>
    %203 = arith.addf %201, %202 : vector<8x32xf32>
    %204 = vector.extract_strided_slice %187 {offsets = [0, 64], sizes = [8, 32], strides = [1, 1]} : vector<8x128xf32> to vector<8x32xf32>
    %205 = math.tanh %204 : vector<8x32xf32>
    %206 = vector.extract_strided_slice %187 {offsets = [0, 96], sizes = [8, 32], strides = [1, 1]} : vector<8x128xf32> to vector<8x32xf32>
    %cst_65 = arith.constant 5.000000e-01 : f32
    %207 = vector.broadcast %cst_65 : f32 to vector<8x32xf32>
    %208 = arith.mulf %207, %206 : vector<8x32xf32>
    %209 = math.tanh %208 : vector<8x32xf32>
    %cst_66 = arith.constant 5.000000e-01 : f32
    %210 = vector.broadcast %cst_66 : f32 to vector<8x32xf32>
    %211 = arith.mulf %210, %209 : vector<8x32xf32>
    %cst_67 = arith.constant 5.000000e-01 : f32
    %212 = vector.broadcast %cst_67 : f32 to vector<8x32xf32>
    %213 = arith.addf %211, %212 : vector<8x32xf32>
    %214 = arith.mulf %203, %145 : vector<8x32xf32>
    %215 = arith.mulf %195, %205 : vector<8x32xf32>
    %216 = arith.addf %214, %215 : vector<8x32xf32>
    %217 = math.tanh %216 : vector<8x32xf32>
    %218 = arith.mulf %213, %217 : vector<8x32xf32>
    %c3 = arith.constant 3 : index
    %c0_68 = arith.constant 0 : index
    %c0_69 = arith.constant 0 : index
    %219 = vector.load %arg1[%c3, %c0_68, %c0_69] : memref<8x8x128xf32, #tpu.memory_space<vmem>>, vector<1x8x128xf32>
    %220 = vector.shape_cast %219 : vector<1x8x128xf32> to vector<8x128xf32>
    %221 = arith.addf %220, %185 : vector<8x128xf32>
    %222 = vector.extract_strided_slice %221 {offsets = [0, 0], sizes = [8, 32], strides = [1, 1]} : vector<8x128xf32> to vector<8x32xf32>
    %cst_70 = arith.constant 5.000000e-01 : f32
    %223 = vector.broadcast %cst_70 : f32 to vector<8x32xf32>
    %224 = arith.mulf %223, %222 : vector<8x32xf32>
    %225 = math.tanh %224 : vector<8x32xf32>
    %cst_71 = arith.constant 5.000000e-01 : f32
    %226 = vector.broadcast %cst_71 : f32 to vector<8x32xf32>
    %227 = arith.mulf %226, %225 : vector<8x32xf32>
    %cst_72 = arith.constant 5.000000e-01 : f32
    %228 = vector.broadcast %cst_72 : f32 to vector<8x32xf32>
    %229 = arith.addf %227, %228 : vector<8x32xf32>
    %230 = vector.extract_strided_slice %221 {offsets = [0, 32], sizes = [8, 32], strides = [1, 1]} : vector<8x128xf32> to vector<8x32xf32>
    %cst_73 = arith.constant 5.000000e-01 : f32
    %231 = vector.broadcast %cst_73 : f32 to vector<8x32xf32>
    %232 = arith.mulf %231, %230 : vector<8x32xf32>
    %233 = math.tanh %232 : vector<8x32xf32>
    %cst_74 = arith.constant 5.000000e-01 : f32
    %234 = vector.broadcast %cst_74 : f32 to vector<8x32xf32>
    %235 = arith.mulf %234, %233 : vector<8x32xf32>
    %cst_75 = arith.constant 5.000000e-01 : f32
    %236 = vector.broadcast %cst_75 : f32 to vector<8x32xf32>
    %237 = arith.addf %235, %236 : vector<8x32xf32>
    %238 = vector.extract_strided_slice %221 {offsets = [0, 64], sizes = [8, 32], strides = [1, 1]} : vector<8x128xf32> to vector<8x32xf32>
    %239 = math.tanh %238 : vector<8x32xf32>
    %240 = vector.extract_strided_slice %221 {offsets = [0, 96], sizes = [8, 32], strides = [1, 1]} : vector<8x128xf32> to vector<8x32xf32>
    %cst_76 = arith.constant 5.000000e-01 : f32
    %241 = vector.broadcast %cst_76 : f32 to vector<8x32xf32>
    %242 = arith.mulf %241, %240 : vector<8x32xf32>
    %243 = math.tanh %242 : vector<8x32xf32>
    %cst_77 = arith.constant 5.000000e-01 : f32
    %244 = vector.broadcast %cst_77 : f32 to vector<8x32xf32>
    %245 = arith.mulf %244, %243 : vector<8x32xf32>
    %cst_78 = arith.constant 5.000000e-01 : f32
    %246 = vector.broadcast %cst_78 : f32 to vector<8x32xf32>
    %247 = arith.addf %245, %246 : vector<8x32xf32>
    %248 = arith.mulf %237, %179 : vector<8x32xf32>
    %249 = arith.mulf %229, %239 : vector<8x32xf32>
    %250 = arith.addf %248, %249 : vector<8x32xf32>
    %251 = math.tanh %250 : vector<8x32xf32>
    %252 = arith.mulf %247, %251 : vector<8x32xf32>
    %253 = tpu.concatenate %252, %218 in 1 : vector<8x32xf32>, vector<8x32xf32> -> vector<8x64xf32>
    %254 = arith.truncf %253 : vector<8x64xf32> to vector<8x64xbf16>
    %cst_79 = arith.constant dense<0.000000e+00> : vector<8x256xf32>
    %255 = tpu.matmul %254, %0, %cst_79 {dimension_numbers = #tpu.dot_dimension_numbers<[1], [0], [0], [1], [0, 0, 1, 1], [], []>} : vector<8x64xbf16>, vector<64x256xbf16>, vector<8x256xf32> -> vector<8x256xf32>
    %256 = vector.extract_strided_slice %255 {offsets = [0, 0], sizes = [8, 128], strides = [1, 1]} : vector<8x256xf32> to vector<8x128xf32>
    %257 = vector.extract_strided_slice %255 {offsets = [0, 128], sizes = [8, 128], strides = [1, 1]} : vector<8x256xf32> to vector<8x128xf32>
    %258 = arith.addf %257, %3 : vector<8x128xf32>
    %259 = vector.extract_strided_slice %258 {offsets = [0, 0], sizes = [8, 32], strides = [1, 1]} : vector<8x128xf32> to vector<8x32xf32>
    %cst_80 = arith.constant 5.000000e-01 : f32
    %260 = vector.broadcast %cst_80 : f32 to vector<8x32xf32>
    %261 = arith.mulf %260, %259 : vector<8x32xf32>
    %262 = math.tanh %261 : vector<8x32xf32>
    %cst_81 = arith.constant 5.000000e-01 : f32
    %263 = vector.broadcast %cst_81 : f32 to vector<8x32xf32>
    %264 = arith.mulf %263, %262 : vector<8x32xf32>
    %cst_82 = arith.constant 5.000000e-01 : f32
    %265 = vector.broadcast %cst_82 : f32 to vector<8x32xf32>
    %266 = arith.addf %264, %265 : vector<8x32xf32>
    %267 = vector.extract_strided_slice %258 {offsets = [0, 32], sizes = [8, 32], strides = [1, 1]} : vector<8x128xf32> to vector<8x32xf32>
    %cst_83 = arith.constant 5.000000e-01 : f32
    %268 = vector.broadcast %cst_83 : f32 to vector<8x32xf32>
    %269 = arith.mulf %268, %267 : vector<8x32xf32>
    %270 = math.tanh %269 : vector<8x32xf32>
    %cst_84 = arith.constant 5.000000e-01 : f32
    %271 = vector.broadcast %cst_84 : f32 to vector<8x32xf32>
    %272 = arith.mulf %271, %270 : vector<8x32xf32>
    %cst_85 = arith.constant 5.000000e-01 : f32
    %273 = vector.broadcast %cst_85 : f32 to vector<8x32xf32>
    %274 = arith.addf %272, %273 : vector<8x32xf32>
    %275 = vector.extract_strided_slice %258 {offsets = [0, 64], sizes = [8, 32], strides = [1, 1]} : vector<8x128xf32> to vector<8x32xf32>
    %276 = math.tanh %275 : vector<8x32xf32>
    %277 = vector.extract_strided_slice %258 {offsets = [0, 96], sizes = [8, 32], strides = [1, 1]} : vector<8x128xf32> to vector<8x32xf32>
    %cst_86 = arith.constant 5.000000e-01 : f32
    %278 = vector.broadcast %cst_86 : f32 to vector<8x32xf32>
    %279 = arith.mulf %278, %277 : vector<8x32xf32>
    %280 = math.tanh %279 : vector<8x32xf32>
    %cst_87 = arith.constant 5.000000e-01 : f32
    %281 = vector.broadcast %cst_87 : f32 to vector<8x32xf32>
    %282 = arith.mulf %281, %280 : vector<8x32xf32>
    %cst_88 = arith.constant 5.000000e-01 : f32
    %283 = vector.broadcast %cst_88 : f32 to vector<8x32xf32>
    %284 = arith.addf %282, %283 : vector<8x32xf32>
    %285 = arith.mulf %274, %216 : vector<8x32xf32>
    %286 = arith.mulf %266, %276 : vector<8x32xf32>
    %287 = arith.addf %285, %286 : vector<8x32xf32>
    %288 = math.tanh %287 : vector<8x32xf32>
    %289 = arith.mulf %284, %288 : vector<8x32xf32>
    %c4 = arith.constant 4 : index
    %c0_89 = arith.constant 0 : index
    %c0_90 = arith.constant 0 : index
    %290 = vector.load %arg1[%c4, %c0_89, %c0_90] : memref<8x8x128xf32, #tpu.memory_space<vmem>>, vector<1x8x128xf32>
    %291 = vector.shape_cast %290 : vector<1x8x128xf32> to vector<8x128xf32>
    %292 = arith.addf %291, %256 : vector<8x128xf32>
    %293 = vector.extract_strided_slice %292 {offsets = [0, 0], sizes = [8, 32], strides = [1, 1]} : vector<8x128xf32> to vector<8x32xf32>
    %cst_91 = arith.constant 5.000000e-01 : f32
    %294 = vector.broadcast %cst_91 : f32 to vector<8x32xf32>
    %295 = arith.mulf %294, %293 : vector<8x32xf32>
    %296 = math.tanh %295 : vector<8x32xf32>
    %cst_92 = arith.constant 5.000000e-01 : f32
    %297 = vector.broadcast %cst_92 : f32 to vector<8x32xf32>
    %298 = arith.mulf %297, %296 : vector<8x32xf32>
    %cst_93 = arith.constant 5.000000e-01 : f32
    %299 = vector.broadcast %cst_93 : f32 to vector<8x32xf32>
    %300 = arith.addf %298, %299 : vector<8x32xf32>
    %301 = vector.extract_strided_slice %292 {offsets = [0, 32], sizes = [8, 32], strides = [1, 1]} : vector<8x128xf32> to vector<8x32xf32>
    %cst_94 = arith.constant 5.000000e-01 : f32
    %302 = vector.broadcast %cst_94 : f32 to vector<8x32xf32>
    %303 = arith.mulf %302, %301 : vector<8x32xf32>
    %304 = math.tanh %303 : vector<8x32xf32>
    %cst_95 = arith.constant 5.000000e-01 : f32
    %305 = vector.broadcast %cst_95 : f32 to vector<8x32xf32>
    %306 = arith.mulf %305, %304 : vector<8x32xf32>
    %cst_96 = arith.constant 5.000000e-01 : f32
    %307 = vector.broadcast %cst_96 : f32 to vector<8x32xf32>
    %308 = arith.addf %306, %307 : vector<8x32xf32>
    %309 = vector.extract_strided_slice %292 {offsets = [0, 64], sizes = [8, 32], strides = [1, 1]} : vector<8x128xf32> to vector<8x32xf32>
    %310 = math.tanh %309 : vector<8x32xf32>
    %311 = vector.extract_strided_slice %292 {offsets = [0, 96], sizes = [8, 32], strides = [1, 1]} : vector<8x128xf32> to vector<8x32xf32>
    %cst_97 = arith.constant 5.000000e-01 : f32
    %312 = vector.broadcast %cst_97 : f32 to vector<8x32xf32>
    %313 = arith.mulf %312, %311 : vector<8x32xf32>
    %314 = math.tanh %313 : vector<8x32xf32>
    %cst_98 = arith.constant 5.000000e-01 : f32
    %315 = vector.broadcast %cst_98 : f32 to vector<8x32xf32>
    %316 = arith.mulf %315, %314 : vector<8x32xf32>
    %cst_99 = arith.constant 5.000000e-01 : f32
    %317 = vector.broadcast %cst_99 : f32 to vector<8x32xf32>
    %318 = arith.addf %316, %317 : vector<8x32xf32>
    %319 = arith.mulf %308, %250 : vector<8x32xf32>
    %320 = arith.mulf %300, %310 : vector<8x32xf32>
    %321 = arith.addf %319, %320 : vector<8x32xf32>
    %322 = math.tanh %321 : vector<8x32xf32>
    %323 = arith.mulf %318, %322 : vector<8x32xf32>
    %324 = tpu.concatenate %323, %289 in 1 : vector<8x32xf32>, vector<8x32xf32> -> vector<8x64xf32>
    %325 = arith.truncf %324 : vector<8x64xf32> to vector<8x64xbf16>
    %cst_100 = arith.constant dense<0.000000e+00> : vector<8x256xf32>
    %326 = tpu.matmul %325, %0, %cst_100 {dimension_numbers = #tpu.dot_dimension_numbers<[1], [0], [0], [1], [0, 0, 1, 1], [], []>} : vector<8x64xbf16>, vector<64x256xbf16>, vector<8x256xf32> -> vector<8x256xf32>
    %327 = vector.extract_strided_slice %326 {offsets = [0, 0], sizes = [8, 128], strides = [1, 1]} : vector<8x256xf32> to vector<8x128xf32>
    %328 = vector.extract_strided_slice %326 {offsets = [0, 128], sizes = [8, 128], strides = [1, 1]} : vector<8x256xf32> to vector<8x128xf32>
    %329 = arith.addf %328, %3 : vector<8x128xf32>
    %330 = vector.extract_strided_slice %329 {offsets = [0, 0], sizes = [8, 32], strides = [1, 1]} : vector<8x128xf32> to vector<8x32xf32>
    %cst_101 = arith.constant 5.000000e-01 : f32
    %331 = vector.broadcast %cst_101 : f32 to vector<8x32xf32>
    %332 = arith.mulf %331, %330 : vector<8x32xf32>
    %333 = math.tanh %332 : vector<8x32xf32>
    %cst_102 = arith.constant 5.000000e-01 : f32
    %334 = vector.broadcast %cst_102 : f32 to vector<8x32xf32>
    %335 = arith.mulf %334, %333 : vector<8x32xf32>
    %cst_103 = arith.constant 5.000000e-01 : f32
    %336 = vector.broadcast %cst_103 : f32 to vector<8x32xf32>
    %337 = arith.addf %335, %336 : vector<8x32xf32>
    %338 = vector.extract_strided_slice %329 {offsets = [0, 32], sizes = [8, 32], strides = [1, 1]} : vector<8x128xf32> to vector<8x32xf32>
    %cst_104 = arith.constant 5.000000e-01 : f32
    %339 = vector.broadcast %cst_104 : f32 to vector<8x32xf32>
    %340 = arith.mulf %339, %338 : vector<8x32xf32>
    %341 = math.tanh %340 : vector<8x32xf32>
    %cst_105 = arith.constant 5.000000e-01 : f32
    %342 = vector.broadcast %cst_105 : f32 to vector<8x32xf32>
    %343 = arith.mulf %342, %341 : vector<8x32xf32>
    %cst_106 = arith.constant 5.000000e-01 : f32
    %344 = vector.broadcast %cst_106 : f32 to vector<8x32xf32>
    %345 = arith.addf %343, %344 : vector<8x32xf32>
    %346 = vector.extract_strided_slice %329 {offsets = [0, 64], sizes = [8, 32], strides = [1, 1]} : vector<8x128xf32> to vector<8x32xf32>
    %347 = math.tanh %346 : vector<8x32xf32>
    %348 = vector.extract_strided_slice %329 {offsets = [0, 96], sizes = [8, 32], strides = [1, 1]} : vector<8x128xf32> to vector<8x32xf32>
    %cst_107 = arith.constant 5.000000e-01 : f32
    %349 = vector.broadcast %cst_107 : f32 to vector<8x32xf32>
    %350 = arith.mulf %349, %348 : vector<8x32xf32>
    %351 = math.tanh %350 : vector<8x32xf32>
    %cst_108 = arith.constant 5.000000e-01 : f32
    %352 = vector.broadcast %cst_108 : f32 to vector<8x32xf32>
    %353 = arith.mulf %352, %351 : vector<8x32xf32>
    %cst_109 = arith.constant 5.000000e-01 : f32
    %354 = vector.broadcast %cst_109 : f32 to vector<8x32xf32>
    %355 = arith.addf %353, %354 : vector<8x32xf32>
    %356 = arith.mulf %345, %287 : vector<8x32xf32>
    %357 = arith.mulf %337, %347 : vector<8x32xf32>
    %358 = arith.addf %356, %357 : vector<8x32xf32>
    %359 = math.tanh %358 : vector<8x32xf32>
    %360 = arith.mulf %355, %359 : vector<8x32xf32>
    %c5 = arith.constant 5 : index
    %c0_110 = arith.constant 0 : index
    %c0_111 = arith.constant 0 : index
    %361 = vector.load %arg1[%c5, %c0_110, %c0_111] : memref<8x8x128xf32, #tpu.memory_space<vmem>>, vector<1x8x128xf32>
    %362 = vector.shape_cast %361 : vector<1x8x128xf32> to vector<8x128xf32>
    %363 = arith.addf %362, %327 : vector<8x128xf32>
    %364 = vector.extract_strided_slice %363 {offsets = [0, 0], sizes = [8, 32], strides = [1, 1]} : vector<8x128xf32> to vector<8x32xf32>
    %cst_112 = arith.constant 5.000000e-01 : f32
    %365 = vector.broadcast %cst_112 : f32 to vector<8x32xf32>
    %366 = arith.mulf %365, %364 : vector<8x32xf32>
    %367 = math.tanh %366 : vector<8x32xf32>
    %cst_113 = arith.constant 5.000000e-01 : f32
    %368 = vector.broadcast %cst_113 : f32 to vector<8x32xf32>
    %369 = arith.mulf %368, %367 : vector<8x32xf32>
    %cst_114 = arith.constant 5.000000e-01 : f32
    %370 = vector.broadcast %cst_114 : f32 to vector<8x32xf32>
    %371 = arith.addf %369, %370 : vector<8x32xf32>
    %372 = vector.extract_strided_slice %363 {offsets = [0, 32], sizes = [8, 32], strides = [1, 1]} : vector<8x128xf32> to vector<8x32xf32>
    %cst_115 = arith.constant 5.000000e-01 : f32
    %373 = vector.broadcast %cst_115 : f32 to vector<8x32xf32>
    %374 = arith.mulf %373, %372 : vector<8x32xf32>
    %375 = math.tanh %374 : vector<8x32xf32>
    %cst_116 = arith.constant 5.000000e-01 : f32
    %376 = vector.broadcast %cst_116 : f32 to vector<8x32xf32>
    %377 = arith.mulf %376, %375 : vector<8x32xf32>
    %cst_117 = arith.constant 5.000000e-01 : f32
    %378 = vector.broadcast %cst_117 : f32 to vector<8x32xf32>
    %379 = arith.addf %377, %378 : vector<8x32xf32>
    %380 = vector.extract_strided_slice %363 {offsets = [0, 64], sizes = [8, 32], strides = [1, 1]} : vector<8x128xf32> to vector<8x32xf32>
    %381 = math.tanh %380 : vector<8x32xf32>
    %382 = vector.extract_strided_slice %363 {offsets = [0, 96], sizes = [8, 32], strides = [1, 1]} : vector<8x128xf32> to vector<8x32xf32>
    %cst_118 = arith.constant 5.000000e-01 : f32
    %383 = vector.broadcast %cst_118 : f32 to vector<8x32xf32>
    %384 = arith.mulf %383, %382 : vector<8x32xf32>
    %385 = math.tanh %384 : vector<8x32xf32>
    %cst_119 = arith.constant 5.000000e-01 : f32
    %386 = vector.broadcast %cst_119 : f32 to vector<8x32xf32>
    %387 = arith.mulf %386, %385 : vector<8x32xf32>
    %cst_120 = arith.constant 5.000000e-01 : f32
    %388 = vector.broadcast %cst_120 : f32 to vector<8x32xf32>
    %389 = arith.addf %387, %388 : vector<8x32xf32>
    %390 = arith.mulf %379, %321 : vector<8x32xf32>
    %391 = arith.mulf %371, %381 : vector<8x32xf32>
    %392 = arith.addf %390, %391 : vector<8x32xf32>
    %393 = math.tanh %392 : vector<8x32xf32>
    %394 = arith.mulf %389, %393 : vector<8x32xf32>
    %395 = tpu.concatenate %394, %360 in 1 : vector<8x32xf32>, vector<8x32xf32> -> vector<8x64xf32>
    %396 = arith.truncf %395 : vector<8x64xf32> to vector<8x64xbf16>
    %cst_121 = arith.constant dense<0.000000e+00> : vector<8x256xf32>
    %397 = tpu.matmul %396, %0, %cst_121 {dimension_numbers = #tpu.dot_dimension_numbers<[1], [0], [0], [1], [0, 0, 1, 1], [], []>} : vector<8x64xbf16>, vector<64x256xbf16>, vector<8x256xf32> -> vector<8x256xf32>
    %398 = vector.extract_strided_slice %397 {offsets = [0, 0], sizes = [8, 128], strides = [1, 1]} : vector<8x256xf32> to vector<8x128xf32>
    %399 = vector.extract_strided_slice %397 {offsets = [0, 128], sizes = [8, 128], strides = [1, 1]} : vector<8x256xf32> to vector<8x128xf32>
    %400 = arith.addf %399, %3 : vector<8x128xf32>
    %401 = vector.extract_strided_slice %400 {offsets = [0, 0], sizes = [8, 32], strides = [1, 1]} : vector<8x128xf32> to vector<8x32xf32>
    %cst_122 = arith.constant 5.000000e-01 : f32
    %402 = vector.broadcast %cst_122 : f32 to vector<8x32xf32>
    %403 = arith.mulf %402, %401 : vector<8x32xf32>
    %404 = math.tanh %403 : vector<8x32xf32>
    %cst_123 = arith.constant 5.000000e-01 : f32
    %405 = vector.broadcast %cst_123 : f32 to vector<8x32xf32>
    %406 = arith.mulf %405, %404 : vector<8x32xf32>
    %cst_124 = arith.constant 5.000000e-01 : f32
    %407 = vector.broadcast %cst_124 : f32 to vector<8x32xf32>
    %408 = arith.addf %406, %407 : vector<8x32xf32>
    %409 = vector.extract_strided_slice %400 {offsets = [0, 32], sizes = [8, 32], strides = [1, 1]} : vector<8x128xf32> to vector<8x32xf32>
    %cst_125 = arith.constant 5.000000e-01 : f32
    %410 = vector.broadcast %cst_125 : f32 to vector<8x32xf32>
    %411 = arith.mulf %410, %409 : vector<8x32xf32>
    %412 = math.tanh %411 : vector<8x32xf32>
    %cst_126 = arith.constant 5.000000e-01 : f32
    %413 = vector.broadcast %cst_126 : f32 to vector<8x32xf32>
    %414 = arith.mulf %413, %412 : vector<8x32xf32>
    %cst_127 = arith.constant 5.000000e-01 : f32
    %415 = vector.broadcast %cst_127 : f32 to vector<8x32xf32>
    %416 = arith.addf %414, %415 : vector<8x32xf32>
    %417 = vector.extract_strided_slice %400 {offsets = [0, 64], sizes = [8, 32], strides = [1, 1]} : vector<8x128xf32> to vector<8x32xf32>
    %418 = math.tanh %417 : vector<8x32xf32>
    %419 = vector.extract_strided_slice %400 {offsets = [0, 96], sizes = [8, 32], strides = [1, 1]} : vector<8x128xf32> to vector<8x32xf32>
    %cst_128 = arith.constant 5.000000e-01 : f32
    %420 = vector.broadcast %cst_128 : f32 to vector<8x32xf32>
    %421 = arith.mulf %420, %419 : vector<8x32xf32>
    %422 = math.tanh %421 : vector<8x32xf32>
    %cst_129 = arith.constant 5.000000e-01 : f32
    %423 = vector.broadcast %cst_129 : f32 to vector<8x32xf32>
    %424 = arith.mulf %423, %422 : vector<8x32xf32>
    %cst_130 = arith.constant 5.000000e-01 : f32
    %425 = vector.broadcast %cst_130 : f32 to vector<8x32xf32>
    %426 = arith.addf %424, %425 : vector<8x32xf32>
    %427 = arith.mulf %416, %358 : vector<8x32xf32>
    %428 = arith.mulf %408, %418 : vector<8x32xf32>
    %429 = arith.addf %427, %428 : vector<8x32xf32>
    %430 = math.tanh %429 : vector<8x32xf32>
    %431 = arith.mulf %426, %430 : vector<8x32xf32>
    %c6 = arith.constant 6 : index
    %c0_131 = arith.constant 0 : index
    %c0_132 = arith.constant 0 : index
    %432 = vector.load %arg1[%c6, %c0_131, %c0_132] : memref<8x8x128xf32, #tpu.memory_space<vmem>>, vector<1x8x128xf32>
    %433 = vector.shape_cast %432 : vector<1x8x128xf32> to vector<8x128xf32>
    %434 = arith.addf %433, %398 : vector<8x128xf32>
    %435 = vector.extract_strided_slice %434 {offsets = [0, 0], sizes = [8, 32], strides = [1, 1]} : vector<8x128xf32> to vector<8x32xf32>
    %cst_133 = arith.constant 5.000000e-01 : f32
    %436 = vector.broadcast %cst_133 : f32 to vector<8x32xf32>
    %437 = arith.mulf %436, %435 : vector<8x32xf32>
    %438 = math.tanh %437 : vector<8x32xf32>
    %cst_134 = arith.constant 5.000000e-01 : f32
    %439 = vector.broadcast %cst_134 : f32 to vector<8x32xf32>
    %440 = arith.mulf %439, %438 : vector<8x32xf32>
    %cst_135 = arith.constant 5.000000e-01 : f32
    %441 = vector.broadcast %cst_135 : f32 to vector<8x32xf32>
    %442 = arith.addf %440, %441 : vector<8x32xf32>
    %443 = vector.extract_strided_slice %434 {offsets = [0, 32], sizes = [8, 32], strides = [1, 1]} : vector<8x128xf32> to vector<8x32xf32>
    %cst_136 = arith.constant 5.000000e-01 : f32
    %444 = vector.broadcast %cst_136 : f32 to vector<8x32xf32>
    %445 = arith.mulf %444, %443 : vector<8x32xf32>
    %446 = math.tanh %445 : vector<8x32xf32>
    %cst_137 = arith.constant 5.000000e-01 : f32
    %447 = vector.broadcast %cst_137 : f32 to vector<8x32xf32>
    %448 = arith.mulf %447, %446 : vector<8x32xf32>
    %cst_138 = arith.constant 5.000000e-01 : f32
    %449 = vector.broadcast %cst_138 : f32 to vector<8x32xf32>
    %450 = arith.addf %448, %449 : vector<8x32xf32>
    %451 = vector.extract_strided_slice %434 {offsets = [0, 64], sizes = [8, 32], strides = [1, 1]} : vector<8x128xf32> to vector<8x32xf32>
    %452 = math.tanh %451 : vector<8x32xf32>
    %453 = vector.extract_strided_slice %434 {offsets = [0, 96], sizes = [8, 32], strides = [1, 1]} : vector<8x128xf32> to vector<8x32xf32>
    %cst_139 = arith.constant 5.000000e-01 : f32
    %454 = vector.broadcast %cst_139 : f32 to vector<8x32xf32>
    %455 = arith.mulf %454, %453 : vector<8x32xf32>
    %456 = math.tanh %455 : vector<8x32xf32>
    %cst_140 = arith.constant 5.000000e-01 : f32
    %457 = vector.broadcast %cst_140 : f32 to vector<8x32xf32>
    %458 = arith.mulf %457, %456 : vector<8x32xf32>
    %cst_141 = arith.constant 5.000000e-01 : f32
    %459 = vector.broadcast %cst_141 : f32 to vector<8x32xf32>
    %460 = arith.addf %458, %459 : vector<8x32xf32>
    %461 = arith.mulf %450, %392 : vector<8x32xf32>
    %462 = arith.mulf %442, %452 : vector<8x32xf32>
    %463 = arith.addf %461, %462 : vector<8x32xf32>
    %464 = math.tanh %463 : vector<8x32xf32>
    %465 = arith.mulf %460, %464 : vector<8x32xf32>
    %466 = tpu.concatenate %465, %431 in 1 : vector<8x32xf32>, vector<8x32xf32> -> vector<8x64xf32>
    %467 = arith.truncf %466 : vector<8x64xf32> to vector<8x64xbf16>
    %cst_142 = arith.constant dense<0.000000e+00> : vector<8x256xf32>
    %468 = tpu.matmul %467, %0, %cst_142 {dimension_numbers = #tpu.dot_dimension_numbers<[1], [0], [0], [1], [0, 0, 1, 1], [], []>} : vector<8x64xbf16>, vector<64x256xbf16>, vector<8x256xf32> -> vector<8x256xf32>
    %469 = vector.extract_strided_slice %468 {offsets = [0, 0], sizes = [8, 128], strides = [1, 1]} : vector<8x256xf32> to vector<8x128xf32>
    %470 = vector.extract_strided_slice %468 {offsets = [0, 128], sizes = [8, 128], strides = [1, 1]} : vector<8x256xf32> to vector<8x128xf32>
    %471 = arith.addf %470, %3 : vector<8x128xf32>
    %472 = vector.extract_strided_slice %471 {offsets = [0, 0], sizes = [8, 32], strides = [1, 1]} : vector<8x128xf32> to vector<8x32xf32>
    %cst_143 = arith.constant 5.000000e-01 : f32
    %473 = vector.broadcast %cst_143 : f32 to vector<8x32xf32>
    %474 = arith.mulf %473, %472 : vector<8x32xf32>
    %475 = math.tanh %474 : vector<8x32xf32>
    %cst_144 = arith.constant 5.000000e-01 : f32
    %476 = vector.broadcast %cst_144 : f32 to vector<8x32xf32>
    %477 = arith.mulf %476, %475 : vector<8x32xf32>
    %cst_145 = arith.constant 5.000000e-01 : f32
    %478 = vector.broadcast %cst_145 : f32 to vector<8x32xf32>
    %479 = arith.addf %477, %478 : vector<8x32xf32>
    %480 = vector.extract_strided_slice %471 {offsets = [0, 32], sizes = [8, 32], strides = [1, 1]} : vector<8x128xf32> to vector<8x32xf32>
    %cst_146 = arith.constant 5.000000e-01 : f32
    %481 = vector.broadcast %cst_146 : f32 to vector<8x32xf32>
    %482 = arith.mulf %481, %480 : vector<8x32xf32>
    %483 = math.tanh %482 : vector<8x32xf32>
    %cst_147 = arith.constant 5.000000e-01 : f32
    %484 = vector.broadcast %cst_147 : f32 to vector<8x32xf32>
    %485 = arith.mulf %484, %483 : vector<8x32xf32>
    %cst_148 = arith.constant 5.000000e-01 : f32
    %486 = vector.broadcast %cst_148 : f32 to vector<8x32xf32>
    %487 = arith.addf %485, %486 : vector<8x32xf32>
    %488 = vector.extract_strided_slice %471 {offsets = [0, 64], sizes = [8, 32], strides = [1, 1]} : vector<8x128xf32> to vector<8x32xf32>
    %489 = math.tanh %488 : vector<8x32xf32>
    %490 = vector.extract_strided_slice %471 {offsets = [0, 96], sizes = [8, 32], strides = [1, 1]} : vector<8x128xf32> to vector<8x32xf32>
    %cst_149 = arith.constant 5.000000e-01 : f32
    %491 = vector.broadcast %cst_149 : f32 to vector<8x32xf32>
    %492 = arith.mulf %491, %490 : vector<8x32xf32>
    %493 = math.tanh %492 : vector<8x32xf32>
    %cst_150 = arith.constant 5.000000e-01 : f32
    %494 = vector.broadcast %cst_150 : f32 to vector<8x32xf32>
    %495 = arith.mulf %494, %493 : vector<8x32xf32>
    %cst_151 = arith.constant 5.000000e-01 : f32
    %496 = vector.broadcast %cst_151 : f32 to vector<8x32xf32>
    %497 = arith.addf %495, %496 : vector<8x32xf32>
    %498 = arith.mulf %487, %429 : vector<8x32xf32>
    %499 = arith.mulf %479, %489 : vector<8x32xf32>
    %500 = arith.addf %498, %499 : vector<8x32xf32>
    %501 = math.tanh %500 : vector<8x32xf32>
    %502 = arith.mulf %497, %501 : vector<8x32xf32>
    %c7 = arith.constant 7 : index
    %c0_152 = arith.constant 0 : index
    %c0_153 = arith.constant 0 : index
    %503 = vector.load %arg1[%c7, %c0_152, %c0_153] : memref<8x8x128xf32, #tpu.memory_space<vmem>>, vector<1x8x128xf32>
    %504 = vector.shape_cast %503 : vector<1x8x128xf32> to vector<8x128xf32>
    %505 = arith.addf %504, %469 : vector<8x128xf32>
    %506 = vector.extract_strided_slice %505 {offsets = [0, 0], sizes = [8, 32], strides = [1, 1]} : vector<8x128xf32> to vector<8x32xf32>
    %cst_154 = arith.constant 5.000000e-01 : f32
    %507 = vector.broadcast %cst_154 : f32 to vector<8x32xf32>
    %508 = arith.mulf %507, %506 : vector<8x32xf32>
    %509 = math.tanh %508 : vector<8x32xf32>
    %cst_155 = arith.constant 5.000000e-01 : f32
    %510 = vector.broadcast %cst_155 : f32 to vector<8x32xf32>
    %511 = arith.mulf %510, %509 : vector<8x32xf32>
    %cst_156 = arith.constant 5.000000e-01 : f32
    %512 = vector.broadcast %cst_156 : f32 to vector<8x32xf32>
    %513 = arith.addf %511, %512 : vector<8x32xf32>
    %514 = vector.extract_strided_slice %505 {offsets = [0, 32], sizes = [8, 32], strides = [1, 1]} : vector<8x128xf32> to vector<8x32xf32>
    %cst_157 = arith.constant 5.000000e-01 : f32
    %515 = vector.broadcast %cst_157 : f32 to vector<8x32xf32>
    %516 = arith.mulf %515, %514 : vector<8x32xf32>
    %517 = math.tanh %516 : vector<8x32xf32>
    %cst_158 = arith.constant 5.000000e-01 : f32
    %518 = vector.broadcast %cst_158 : f32 to vector<8x32xf32>
    %519 = arith.mulf %518, %517 : vector<8x32xf32>
    %cst_159 = arith.constant 5.000000e-01 : f32
    %520 = vector.broadcast %cst_159 : f32 to vector<8x32xf32>
    %521 = arith.addf %519, %520 : vector<8x32xf32>
    %522 = vector.extract_strided_slice %505 {offsets = [0, 64], sizes = [8, 32], strides = [1, 1]} : vector<8x128xf32> to vector<8x32xf32>
    %523 = math.tanh %522 : vector<8x32xf32>
    %524 = vector.extract_strided_slice %505 {offsets = [0, 96], sizes = [8, 32], strides = [1, 1]} : vector<8x128xf32> to vector<8x32xf32>
    %cst_160 = arith.constant 5.000000e-01 : f32
    %525 = vector.broadcast %cst_160 : f32 to vector<8x32xf32>
    %526 = arith.mulf %525, %524 : vector<8x32xf32>
    %527 = math.tanh %526 : vector<8x32xf32>
    %cst_161 = arith.constant 5.000000e-01 : f32
    %528 = vector.broadcast %cst_161 : f32 to vector<8x32xf32>
    %529 = arith.mulf %528, %527 : vector<8x32xf32>
    %cst_162 = arith.constant 5.000000e-01 : f32
    %530 = vector.broadcast %cst_162 : f32 to vector<8x32xf32>
    %531 = arith.addf %529, %530 : vector<8x32xf32>
    %532 = arith.mulf %521, %463 : vector<8x32xf32>
    %533 = arith.mulf %513, %523 : vector<8x32xf32>
    %534 = arith.addf %532, %533 : vector<8x32xf32>
    %535 = math.tanh %534 : vector<8x32xf32>
    %536 = arith.mulf %531, %535 : vector<8x32xf32>
    %537 = tpu.concatenate %536, %502 in 1 : vector<8x32xf32>, vector<8x32xf32> -> vector<8x64xf32>
    %538 = arith.truncf %537 : vector<8x64xf32> to vector<8x64xbf16>
    %cst_163 = arith.constant dense<0.000000e+00> : vector<8x256xf32>
    %539 = tpu.matmul %538, %0, %cst_163 {dimension_numbers = #tpu.dot_dimension_numbers<[1], [0], [0], [1], [0, 0, 1, 1], [], []>} : vector<8x64xbf16>, vector<64x256xbf16>, vector<8x256xf32> -> vector<8x256xf32>
    %540 = vector.extract_strided_slice %539 {offsets = [0, 128], sizes = [8, 128], strides = [1, 1]} : vector<8x256xf32> to vector<8x128xf32>
    %541 = arith.addf %540, %3 : vector<8x128xf32>
    %542 = vector.extract_strided_slice %541 {offsets = [0, 0], sizes = [8, 32], strides = [1, 1]} : vector<8x128xf32> to vector<8x32xf32>
    %cst_164 = arith.constant 5.000000e-01 : f32
    %543 = vector.broadcast %cst_164 : f32 to vector<8x32xf32>
    %544 = arith.mulf %543, %542 : vector<8x32xf32>
    %545 = math.tanh %544 : vector<8x32xf32>
    %cst_165 = arith.constant 5.000000e-01 : f32
    %546 = vector.broadcast %cst_165 : f32 to vector<8x32xf32>
    %547 = arith.mulf %546, %545 : vector<8x32xf32>
    %cst_166 = arith.constant 5.000000e-01 : f32
    %548 = vector.broadcast %cst_166 : f32 to vector<8x32xf32>
    %549 = arith.addf %547, %548 : vector<8x32xf32>
    %550 = vector.extract_strided_slice %541 {offsets = [0, 32], sizes = [8, 32], strides = [1, 1]} : vector<8x128xf32> to vector<8x32xf32>
    %cst_167 = arith.constant 5.000000e-01 : f32
    %551 = vector.broadcast %cst_167 : f32 to vector<8x32xf32>
    %552 = arith.mulf %551, %550 : vector<8x32xf32>
    %553 = math.tanh %552 : vector<8x32xf32>
    %cst_168 = arith.constant 5.000000e-01 : f32
    %554 = vector.broadcast %cst_168 : f32 to vector<8x32xf32>
    %555 = arith.mulf %554, %553 : vector<8x32xf32>
    %cst_169 = arith.constant 5.000000e-01 : f32
    %556 = vector.broadcast %cst_169 : f32 to vector<8x32xf32>
    %557 = arith.addf %555, %556 : vector<8x32xf32>
    %558 = vector.extract_strided_slice %541 {offsets = [0, 64], sizes = [8, 32], strides = [1, 1]} : vector<8x128xf32> to vector<8x32xf32>
    %559 = math.tanh %558 : vector<8x32xf32>
    %560 = vector.extract_strided_slice %541 {offsets = [0, 96], sizes = [8, 32], strides = [1, 1]} : vector<8x128xf32> to vector<8x32xf32>
    %cst_170 = arith.constant 5.000000e-01 : f32
    %561 = vector.broadcast %cst_170 : f32 to vector<8x32xf32>
    %562 = arith.mulf %561, %560 : vector<8x32xf32>
    %563 = math.tanh %562 : vector<8x32xf32>
    %cst_171 = arith.constant 5.000000e-01 : f32
    %564 = vector.broadcast %cst_171 : f32 to vector<8x32xf32>
    %565 = arith.mulf %564, %563 : vector<8x32xf32>
    %cst_172 = arith.constant 5.000000e-01 : f32
    %566 = vector.broadcast %cst_172 : f32 to vector<8x32xf32>
    %567 = arith.addf %565, %566 : vector<8x32xf32>
    %568 = arith.mulf %557, %500 : vector<8x32xf32>
    %569 = arith.mulf %549, %559 : vector<8x32xf32>
    %570 = arith.addf %568, %569 : vector<8x32xf32>
    %571 = math.tanh %570 : vector<8x32xf32>
    %572 = arith.mulf %567, %571 : vector<8x32xf32>
    %c0_173 = arith.constant 0 : index
    %c0_174 = arith.constant 0 : index
    %573 = vector.load %arg4[%c0_173, %c0_174] : memref<1x32xf32, #tpu.memory_space<vmem>>, vector<1x32xf32>
    %574 = vector.broadcast %573 : vector<1x32xf32> to vector<8x32xf32>
    %575 = arith.mulf %572, %574 : vector<8x32xf32>
    %cst_175 = arith.constant dense<0.000000e+00> : vector<8xf32>
    %576 = vector.multi_reduction <add>, %575, %cst_175 [1] : vector<8x32xf32> to vector<8xf32>
    %577 = vector.shape_cast %576 : vector<8xf32> to vector<8x1xf32>
    %c0_176 = arith.constant 0 : index
    %c0_177 = arith.constant 0 : index
    %578 = vector.load %arg5[%c0_176, %c0_177] : memref<1x1xf32, #tpu.memory_space<vmem>>, vector<1x1xf32>
    %579 = vector.broadcast %578 : vector<1x1xf32> to vector<8x1xf32>
    %580 = arith.addf %577, %579 : vector<8x1xf32>
    %cst_178 = arith.constant 5.000000e-01 : f32
    %581 = vector.broadcast %cst_178 : f32 to vector<8x1xf32>
    %582 = arith.mulf %581, %580 : vector<8x1xf32>
    %583 = math.tanh %582 : vector<8x1xf32>
    %cst_179 = arith.constant 5.000000e-01 : f32
    %584 = vector.broadcast %cst_179 : f32 to vector<8x1xf32>
    %585 = arith.mulf %584, %583 : vector<8x1xf32>
    %cst_180 = arith.constant 5.000000e-01 : f32
    %586 = vector.broadcast %cst_180 : f32 to vector<8x1xf32>
    %587 = arith.addf %585, %586 : vector<8x1xf32>
    %c0_181 = arith.constant 0 : index
    %c0_182 = arith.constant 0 : index
    %588 = vector.load %arg6[%c0_181, %c0_182] : memref<8x1xf32, #tpu.memory_space<vmem>>, vector<8x1xf32>
    tpu.vector_store %arg6[%c0_181, %c0_182], %587 {strides = array<i32>} : memref<8x1xf32, #tpu.memory_space<vmem>>, vector<8x1xf32>,
    return
  }
  func.func @transform_0(%arg0: i32) -> (i32, i32, i32) {
    %c0_i32 = arith.constant 0 : i32
    %c0_i32_0 = arith.constant 0 : i32
    %c0_i32_1 = arith.constant 0 : i32
    return %c0_i32, %arg0, %c0_i32_0 : i32, i32, i32
  }
  func.func @transform_1(%arg0: i32) -> (i32, i32) {
    %c0_i32 = arith.constant 0 : i32
    %c0_i32_0 = arith.constant 0 : i32
    %c0_i32_1 = arith.constant 0 : i32
    return %c0_i32, %c0_i32_0 : i32, i32
  }
  func.func @transform_2(%arg0: i32) -> (i32, i32) {
    %c0_i32 = arith.constant 0 : i32
    %c0_i32_0 = arith.constant 0 : i32
    %c0_i32_1 = arith.constant 0 : i32
    return %c0_i32, %c0_i32_0 : i32, i32
  }
  func.func @transform_3(%arg0: i32) -> (i32, i32) {
    %c0_i32 = arith.constant 0 : i32
    %c0_i32_0 = arith.constant 0 : i32
    %c0_i32_1 = arith.constant 0 : i32
    return %c0_i32, %c0_i32_0 : i32, i32
  }
  func.func @transform_4(%arg0: i32) -> (i32, i32) {
    %c0_i32 = arith.constant 0 : i32
    %c0_i32_0 = arith.constant 0 : i32
    %c0_i32_1 = arith.constant 0 : i32
    return %c0_i32, %c0_i32_0 : i32, i32
  }
  func.func @transform_5(%arg0: i32) -> (i32, i32) {
    %c0_i32 = arith.constant 0 : i32
    %c0_i32_0 = arith.constant 0 : i32
    return %arg0, %c0_i32 : i32, i32
  }
}

</mosaic_0001>

<bundles_post_ra>
// kernel: tpu_custom_call.1
= control target key start
LH: loop header
LB: loop body
LE: loop exit
PB: predicated region body
PF: predicated region fallthrough
CT: control target
= control target key end

     0   :  { %s1397_s0 = inlined_call_operand.hbm [shape: f32[8,8,128], index: 0, kind: input, shape index: {}]   ;;  %s1398_s1 = inlined_call_operand.hbm [shape: bf16[64,256], index: 1, kind: input, shape index: {}]   ;;  %s1399_s2 = inlined_call_operand.vmem [shape: f32[1,128], index: 2, kind: input, shape index: {}]   ;;  %s1400_s3 = inlined_call_operand.vmem [shape: f32[1,32], index: 3, kind: input, shape index: {}]   ;;  %s1401_s4 = inlined_call_operand.<no memory space> [shape: f32[1,1], index: 4, kind: input, shape index: {}]   ;;  %s1402_s5 = inlined_call_operand.vmem [shape: f32[8,1], index: 5, kind: output, shape index: {}]  }
   0x1   :  { %v10_v0 = vstv %s1401_s4 }
   0x2   :  { %11 = vst [vmem:[#allocation2] sm:$0x1] %v10_v0 }
   0x3   :  { %12 = vsyncpa [#allocation4], 0 }
   0x4   :  { %13 = vsyncpa [#allocation6], 0  ;;  %s1140_s20 = smov [#allocation3]   ;;  %s1092_s24 = scalar_lea.hbm %s1397_s0, 1024 }
   0x5   :  { %s19_s21 = sshll.u32 %s1140_s20, 4  ;;  %p1093_p0 = scmp.ne.s32.totalorder %s1397_s0, %s1092_s24  ;;  %s20_s21 = int_to_ptr.vmem [resolvable:$true] %s19_s21 }
   0x6   :  { %p1096_p1 = scmp.lt.u32.totalorder %s1092_s24, %s1397_s0 }
   0x8   :  { %p1098_p2 = pnand %p1096_p1, %p1093_p0 }
   0xa   :  { %1101 = shalt.err (!%p1098_p2)
}
   0xb   :  { %s1102_s4 = scalar_lea.vmem %s20_s21, 1024  ;;  %p1107_p4 = scmp.lt.s32.totalorder %s20_s21, %s20_s21 }
   0xc   :  { %p1103_p3 = scmp.ne.s32.totalorder %s20_s21, %s1102_s4  ;;  %p1108_p5 = scmp.lt.s32.totalorder %s1102_s4, %s1102_s4 }
   0xe   :  { %p1109_p6 = por %p1108_p5, %p1107_p4 }
  0x10   :  { %p1110_p7 = pnand %p1109_p6, %p1103_p3 }
  0x12   :  { %1113 = shalt.err (!%p1110_p7)
}
  0x13   :  { %s1141_s29 = smov 128   ;;  %s1142_s30 = smov 8  }
  0x14   :  { %25 = dma.hbm_to_vmem [thread:$0]  %s1397_s0, 1024, %s20_s21, [#allocation4], %s1141_s29, %s1141_s29, %s1142_s30  }
  0x15   :  { %s1143_s8 = smov [#allocation5]   ;;  %s1114_s12 = scalar_lea.hbm %s1398_s1, 1024 }
  0x16   :  { %s31_s9 = sshll.u32 %s1143_s8, 4  ;;  %p1115_p8 = scmp.ne.s32.totalorder %s1398_s1, %s1114_s12  ;;  %s32_s9 = int_to_ptr.vmem [resolvable:$true] %s31_s9 }
  0x17   :  { %p1118_p9 = scmp.lt.u32.totalorder %s1114_s12, %s1398_s1 }
  0x19   :  { %p1120_p10 = pnand %p1118_p9, %p1115_p8 }
  0x1b   :  { %1123 = shalt.err (!%p1120_p10)
}
  0x1c   :  { %s1124_s17 = scalar_lea.vmem %s32_s9, 1024  ;;  %p1129_p12 = scmp.lt.s32.totalorder %s32_s9, %s32_s9 }
  0x1d   :  { %p1125_p11 = scmp.ne.s32.totalorder %s32_s9, %s1124_s17  ;;  %p1130_p13 = scmp.lt.s32.totalorder %s1124_s17, %s1124_s17 }
  0x1f   :  { %p1131_p0 = por %p1130_p13, %p1129_p12 }
  0x21   :  { %p1132_p1 = pnand %p1131_p0, %p1125_p11 }
  0x23   :  { %1135 = shalt.err (!%p1132_p1)
}
  0x24   :  { %37 = dma.hbm_to_vmem [thread:$0]  %s1398_s1, 1024, %s32_s9, [#allocation6], %s1141_s29, %s1141_s29, %s1142_s30  }
  0x25   :  { %1136 = dma.done.wait [#allocation4], 1024  }
  0x26   :  { %1137 = vsyncadd [#allocation4], 4294966272 }
  0x27   :  { %1138 = dma.done.wait [#allocation6], 1024  }
  0x28   :  { %1139 = vsyncadd [#allocation6], 4294966272  ;;  %v66_v1 = vld [vmem:[#allocation3] sm:$0xff]  ;;  %s1144_s19 = smov 64   ;;  %s1145_s20 = smov 32   ;;  %v1146_v21 = vmov 0  }
  0x29   :  { %994 = vtanh.f32 %v66_v1  ;;  %v68_v3 = vmul.f32 0.5, %v66_v1  ;;  %v1210_v12 = vld [vmem:[#allocation5 + $0x4] ss:$8 sps:$4 sm:$0xff]   ;;  %v1212_v13 = vld [vmem:[#allocation5] ss:$8 sps:$4 sm:$0xff]   ;;  %173 = vmatprep.mubr.bf16.mxu0 %v1146_v21  ;;  %275 = vmatprep.mubr.bf16.mxu1 %v1146_v21  ;;  %vm94_vm0 = vcmask 261120  }
  0x2a   :  { %v1214_v14 = vld [vmem:[#allocation5 + $0x14] ss:$8 sps:$4 sm:$0xff]   ;;  %141 = vmatprep.subr.bf16.mxu0 %v1210_v12  ;;  %243 = vmatprep.subr.bf16.mxu1 %v1210_v12  ;;  %v1219_v15 = vld [vmem:[#allocation5 + $0x10] ss:$8 sps:$4 sm:$0xff]   ;;  %v1223_v16 = vld [vmem:[#allocation5 + $0x24] ss:$8 sps:$4 sm:$0xff]  }
  0x2b   :  { %996 = vtanh.f32 %v68_v3  ;;  %142 = vmatpush1.bf16.msra.mxu0 %v1212_v13  ;;  %244 = vmatpush1.bf16.msra.mxu1 %v1212_v13  ;;  %v1227_v17 = vld [vmem:[#allocation5 + $0x20] ss:$8 sps:$4 sm:$0xff]   ;;  %v1235_v19 = vld [vmem:[#allocation5 + $0x34] ss:$8 sps:$4 sm:$0xff]   ;;  %v1237_v20 = vld [vmem:[#allocation5 + $0x30] ss:$8 sps:$4 sm:$0xff]  }
  0x2c   :  { %143 = vmatprep.subr.bf16.mxu0 %v1214_v14  ;;  %245 = vmatprep.subr.bf16.mxu1 %v1214_v14  ;;  %vm137_vm1 = vcmask 523264   ;;  %v206_v27 = vld [vmem:[#allocation3 + $0x8] sm:$0xff]  ;;  %v1262_v28 = vld [vmem:[%s1399_s2] ss:$0 sm:$0xff]  ;;  %v308_v1 = vld [vmem:[#allocation3 + $0x10] sm:$0xff]  ;;  %s1147_s23 = smov 96  }
  0x2d   :  { %vm947_vm2 = vcmask 7168  }
  0x2f   :  { %144 = vmatpush1.bf16.msra.mxu0 %v1219_v15  ;;  %246 = vmatpush1.bf16.msra.mxu1 %v1219_v15 }
  0x30   :  { %145 = vmatprep.subr.bf16.mxu0 %v1223_v16  ;;  %247 = vmatprep.subr.bf16.mxu1 %v1223_v16 }
  0x33   :  { %v995_v2 = vpop.eup %994  ;;  %146 = vmatpush1.bf16.msra.mxu0 %v1227_v17  ;;  %248 = vmatpush1.bf16.msra.mxu1 %v1227_v17 }
  0x34   :  { %75 = vrot.lane.b32.xlu0 %v995_v2, %s1144_s19  ;;  %147 = vmatprep.subr.bf16.mxu0 %v1235_v19 }
  0x35   :  { %v997_v4 = vpop.eup %996  ;;  %249 = vmatprep.subr.bf16.mxu1 %v1235_v19 }
  0x36   :  { %v70_v5 = vmul.f32 0.5, %v997_v4 }
  0x37   :  { %148 = vmatpush1.bf16.msra.mxu0 %v1237_v20  ;;  %250 = vmatpush1.bf16.msra.mxu1 %v1237_v20 }
  0x38   :  { %v71_v6 = vadd.f32 0.5, %v70_v5  ;;  %345 = vmatprep.subr.bf16.mxu0 %v1210_v12  ;;  %447 = vmatprep.subr.bf16.mxu1 %v1210_v12 }
  0x3a   :  { %v73_v9 = vmul.f32 0.0, %v71_v6 }
  0xa6   :  { %v76_v7 = vpop.permute.xlu0 %75 }
  0xa7   :  { %v78_v8 = vmul.f32 %v76_v7, %v71_v6 }
  0xa9   :  { %80 = vrot.lane.b32.xlu0 %v78_v8, %s1145_s20 }
 0x11b   :  { %v81_v10 = vpop.permute.xlu0 %80 }
 0x11c   :  { %v1207_v11 = vadd.f32 %v81_v10, %v73_v9 }
 0x11e   :  { %998 = vtanh.f32 %v1207_v11 }
 0x128   :  { %v999_v18 = vpop.eup %998 }
 0x129   :  { %86 = vrot.lane.b32.xlu1 %v999_v18, %s1144_s19 }
 0x19b   :  { %v87_v22 = vpop.permute.xlu1 %86 }
 0x19c   :  { %v89_v23 = vmul.f32 %v87_v22, %v71_v6 }
 0x19e   :  { %91 = vrot.lane.b32.xlu1 %v89_v23, %s1145_s20 }
 0x210   :  { %v92_v24 = vpop.permute.xlu1 %91 }
 0x211   :  { %v95_v25 = vsel %vm94_vm0, %v92_v24, 0.0 }
 0x212   :  { %v96_v26 = vpack.c.bf16 %v95_v25, %v95_v25 }
 0x214   :  { %964 = vmatmul.mubr.msk.bf16.vlgmr.msra.gmra.mrb[0].mxu0 %vm137_vm1, %v96_v26 }
 0x215   :  { %346 = vmatpush1.bf16.msra.mxu0 %v1212_v13  ;;  %377 = vmatprep.mubr.bf16.mxu0 %v1146_v21 }
 0x216   :  { %347 = vmatprep.subr.bf16.mxu0 %v1214_v14 }
 0x219   :  { %348 = vmatpush1.bf16.msra.mxu0 %v1219_v15 }
 0x21a   :  { %349 = vmatprep.subr.bf16.mxu0 %v1223_v16 }
 0x21d   :  { %350 = vmatpush1.bf16.msra.mxu0 %v1227_v17 }
 0x21e   :  { %351 = vmatprep.subr.bf16.mxu0 %v1235_v19 }
 0x221   :  { %352 = vmatpush1.bf16.msra.mxu0 %v1237_v20 }
 0x222   :  { %549 = vmatprep.subr.bf16.mxu0 %v1210_v12 }
 0x2e7   :  { %v175_v29 = vpop.f32.mrb[0].mxu0 }
 0x2e8   :  { %v207_v30 = vadd.f32 %v206_v27, %v175_v29  ;;  %v177_v31 = vpop.f32.mrb[1].mxu0 }
 0x2e9   :  { %v182_v32 = vadd.f32 %v1262_v28, %v177_v31  ;;  %v179_v33 = vpop.f32.mrb[2].mxu0 }
 0x2ea   :  { %1000 = vtanh.f32 %v207_v30  ;;  %v180_v34 = vpop.f32.mrb[3].mxu0  ;;  %v208_v37 = vmul.f32 0.5, %v207_v30 }
 0x2eb   :  { %1002 = vtanh.f32 %v182_v32  ;;  %v183_v38 = vmul.f32 0.5, %v182_v32 }
 0x2ec   :  { %1004 = vtanh.f32 %v208_v37 }
 0x2ed   :  { %1006 = vtanh.f32 %v183_v38 }
 0x2f4   :  { %v1001_v35 = vpop.eup %1000 }
 0x2f5   :  { %v1003_v36 = vpop.eup %1002  ;;  %215 = vrot.lane.b32.xlu1 %v1001_v35, %s1144_s19 }
 0x2f6   :  { %190 = vrot.lane.b32.xlu0 %v1003_v36, %s1144_s19  ;;  %v1005_v39 = vpop.eup %1004 }
 0x2f7   :  { %v1007_v40 = vpop.eup %1006  ;;  %v210_v41 = vmul.f32 0.5, %v1005_v39 }
 0x2f8   :  { %v185_v42 = vmul.f32 0.5, %v1007_v40 }
 0x2f9   :  { %v211_v43 = vadd.f32 0.5, %v210_v41 }
 0x2fa   :  { %v186_v45 = vadd.f32 0.5, %v185_v42 }
 0x2fb   :  { %v213_v49 = vmul.f32 %v211_v43, %v1207_v11 }
 0x2fc   :  { %v188_v51 = vmul.f32 0.0, %v186_v45 }
 0x367   :  { %v216_v44 = vpop.permute.xlu1 %215 }
 0x368   :  { %v218_v46 = vmul.f32 %v216_v44, %v211_v43  ;;  %v191_v47 = vpop.permute.xlu0 %190 }
 0x369   :  { %v193_v48 = vmul.f32 %v191_v47, %v186_v45 }
 0x36a   :  { %220 = vrot.lane.b32.xlu1 %v218_v46, %s1145_s20 }
 0x36b   :  { %195 = vrot.lane.b32.xlu0 %v193_v48, %s1145_s20  ;;  %v410_v48 = vld [vmem:[#allocation3 + $0x18] sm:$0xff] }
 0x3dc   :  { %v221_v50 = vpop.permute.xlu1 %220 }
 0x3dd   :  { %v223_v52 = vadd.f32 %v221_v50, %v213_v49  ;;  %v196_v53 = vpop.permute.xlu0 %195 }
 0x3de   :  { %v198_v54 = vadd.f32 %v196_v53, %v188_v51 }
 0x3df   :  { %1008 = vtanh.f32 %v223_v52 }
 0x3e0   :  { %1010 = vtanh.f32 %v198_v54 }
 0x3e9   :  { %v1009_v55 = vpop.eup %1008 }
 0x3ea   :  { %v1011_v56 = vpop.eup %1010  ;;  %226 = vrot.lane.b32.xlu1 %v1009_v55, %s1144_s19 }
 0x3eb   :  { %201 = vrot.lane.b32.xlu0 %v1011_v56, %s1144_s19 }
 0x45c   :  { %v227_v57 = vpop.permute.xlu1 %226 }
 0x45d   :  { %v229_v58 = vmul.f32 %v227_v57, %v211_v43  ;;  %v202_v59 = vpop.permute.xlu0 %201 }
 0x45e   :  { %v204_v60 = vmul.f32 %v202_v59, %v186_v45 }
 0x45f   :  { %231 = vrot.lane.b32.xlu0 %v229_v58, %s1145_s20 }
 0x460   :  { %235 = vrot.lane.b32.xlu1 %v204_v60, %s1144_s19 }
 0x4d1   :  { %v232_v61 = vpop.permute.xlu0 %231 }
 0x4d2   :  { %v236_v62 = vpop.permute.xlu1 %235 }
 0x4d3   :  { %v238_v63 = vsel %vm94_vm0, %v232_v61, %v236_v62 }
 0x4d4   :  { %v239_v0 = vpack.c.bf16 %v238_v63, %v238_v63 }
 0x4d6   :  { %965 = vmatmul.mubr.msk.bf16.vlgmr.msra.gmra.mrb[0].mxu1 %vm137_vm1, %v239_v0 }
 0x4d7   :  { %448 = vmatpush1.bf16.msra.mxu1 %v1212_v13  ;;  %479 = vmatprep.mubr.bf16.mxu1 %v1146_v21 }
 0x4d8   :  { %449 = vmatprep.subr.bf16.mxu1 %v1214_v14 }
 0x4db   :  { %450 = vmatpush1.bf16.msra.mxu1 %v1219_v15 }
 0x4dc   :  { %451 = vmatprep.subr.bf16.mxu1 %v1223_v16 }
 0x4df   :  { %452 = vmatpush1.bf16.msra.mxu1 %v1227_v17 }
 0x4e0   :  { %453 = vmatprep.subr.bf16.mxu1 %v1235_v19 }
 0x4e3   :  { %454 = vmatpush1.bf16.msra.mxu1 %v1237_v20 }
 0x4e4   :  { %651 = vmatprep.subr.bf16.mxu1 %v1210_v12 }
 0x5a9   :  { %v277_v2 = vpop.f32.mrb[0].mxu1 }
 0x5aa   :  { %v309_v3 = vadd.f32 %v308_v1, %v277_v2  ;;  %v279_v4 = vpop.f32.mrb[1].mxu1 }
 0x5ab   :  { %v284_v5 = vadd.f32 %v1262_v28, %v279_v4  ;;  %v281_v6 = vpop.f32.mrb[2].mxu1 }
 0x5ac   :  { %1012 = vtanh.f32 %v309_v3  ;;  %v282_v7 = vpop.f32.mrb[3].mxu1  ;;  %v310_v10 = vmul.f32 0.5, %v309_v3 }
 0x5ad   :  { %1014 = vtanh.f32 %v284_v5  ;;  %v285_v11 = vmul.f32 0.5, %v284_v5 }
 0x5ae   :  { %1016 = vtanh.f32 %v310_v10 }
 0x5af   :  { %1018 = vtanh.f32 %v285_v11 }
 0x5b6   :  { %v1013_v8 = vpop.eup %1012 }
 0x5b7   :  { %v1015_v9 = vpop.eup %1014  ;;  %317 = vrot.lane.b32.xlu1 %v1013_v8, %s1144_s19 }
 0x5b8   :  { %292 = vrot.lane.b32.xlu0 %v1015_v9, %s1144_s19  ;;  %v1017_v18 = vpop.eup %1016 }
 0x5b9   :  { %v1019_v22 = vpop.eup %1018  ;;  %v312_v23 = vmul.f32 0.5, %v1017_v18 }
 0x5ba   :  { %v287_v24 = vmul.f32 0.5, %v1019_v22 }
 0x5bb   :  { %v313_v25 = vadd.f32 0.5, %v312_v23 }
 0x5bc   :  { %v288_v27 = vadd.f32 0.5, %v287_v24 }
 0x5bd   :  { %v315_v32 = vmul.f32 %v313_v25, %v223_v52 }
 0x5be   :  { %v290_v34 = vmul.f32 %v288_v27, %v198_v54 }
 0x629   :  { %v318_v26 = vpop.permute.xlu1 %317 }
 0x62a   :  { %v320_v29 = vmul.f32 %v318_v26, %v313_v25  ;;  %v293_v30 = vpop.permute.xlu0 %292 }
 0x62b   :  { %v295_v31 = vmul.f32 %v293_v30, %v288_v27 }
 0x62c   :  { %322 = vrot.lane.b32.xlu1 %v320_v29, %s1145_s20 }
 0x62d   :  { %297 = vrot.lane.b32.xlu0 %v295_v31, %s1145_s20  ;;  %v512_v31 = vld [vmem:[#allocation3 + $0x20] sm:$0xff] }
 0x69e   :  { %v323_v33 = vpop.permute.xlu1 %322 }
 0x69f   :  { %v325_v35 = vadd.f32 %v323_v33, %v315_v32  ;;  %v298_v36 = vpop.permute.xlu0 %297 }
 0x6a0   :  { %v300_v37 = vadd.f32 %v298_v36, %v290_v34 }
 0x6a1   :  { %1020 = vtanh.f32 %v325_v35 }
 0x6a2   :  { %1022 = vtanh.f32 %v300_v37 }
 0x6ab   :  { %v1021_v38 = vpop.eup %1020 }
 0x6ac   :  { %v1023_v39 = vpop.eup %1022  ;;  %328 = vrot.lane.b32.xlu1 %v1021_v38, %s1144_s19 }
 0x6ad   :  { %303 = vrot.lane.b32.xlu0 %v1023_v39, %s1144_s19 }
 0x71e   :  { %v329_v40 = vpop.permute.xlu1 %328 }
 0x71f   :  { %v331_v41 = vmul.f32 %v329_v40, %v313_v25  ;;  %v304_v42 = vpop.permute.xlu0 %303 }
 0x720   :  { %v306_v43 = vmul.f32 %v304_v42, %v288_v27 }
 0x721   :  { %333 = vrot.lane.b32.xlu0 %v331_v41, %s1145_s20 }
 0x722   :  { %337 = vrot.lane.b32.xlu1 %v306_v43, %s1144_s19 }
 0x793   :  { %v334_v44 = vpop.permute.xlu0 %333 }
 0x794   :  { %v338_v45 = vpop.permute.xlu1 %337 }
 0x795   :  { %v340_v46 = vsel %vm94_vm0, %v334_v44, %v338_v45 }
 0x796   :  { %v341_v47 = vpack.c.bf16 %v340_v46, %v340_v46 }
 0x798   :  { %966 = vmatmul.mubr.msk.bf16.vlgmr.msra.gmra.mrb[4].mxu0 %vm137_vm1, %v341_v47 }
 0x799   :  { %550 = vmatpush1.bf16.msra.mxu0 %v1212_v13  ;;  %581 = vmatprep.mubr.bf16.mxu0 %v1146_v21 }
 0x79a   :  { %551 = vmatprep.subr.bf16.mxu0 %v1214_v14 }
 0x79d   :  { %552 = vmatpush1.bf16.msra.mxu0 %v1219_v15 }
 0x79e   :  { %553 = vmatprep.subr.bf16.mxu0 %v1223_v16 }
 0x7a1   :  { %554 = vmatpush1.bf16.msra.mxu0 %v1227_v17 }
 0x7a2   :  { %555 = vmatprep.subr.bf16.mxu0 %v1235_v19 }
 0x7a5   :  { %556 = vmatpush1.bf16.msra.mxu0 %v1237_v20 }
 0x7a6   :  { %753 = vmatprep.subr.bf16.mxu0 %v1210_v12 }
 0x86b   :  { %v379_v49 = vpop.f32.mrb[4].mxu0 }
 0x86c   :  { %v411_v50 = vadd.f32 %v410_v48, %v379_v49  ;;  %v381_v51 = vpop.f32.mrb[5].mxu0 }
 0x86d   :  { %v386_v52 = vadd.f32 %v1262_v28, %v381_v51  ;;  %v383_v53 = vpop.f32.mrb[6].mxu0 }
 0x86e   :  { %1024 = vtanh.f32 %v411_v50  ;;  %v384_v54 = vpop.f32.mrb[7].mxu0  ;;  %v412_v57 = vmul.f32 0.5, %v411_v50 }
 0x86f   :  { %1026 = vtanh.f32 %v386_v52  ;;  %v387_v58 = vmul.f32 0.5, %v386_v52 }
 0x870   :  { %1028 = vtanh.f32 %v412_v57 }
 0x871   :  { %1030 = vtanh.f32 %v387_v58 }
 0x878   :  { %v1025_v55 = vpop.eup %1024 }
 0x879   :  { %v1027_v56 = vpop.eup %1026  ;;  %419 = vrot.lane.b32.xlu1 %v1025_v55, %s1144_s19 }
 0x87a   :  { %394 = vrot.lane.b32.xlu0 %v1027_v56, %s1144_s19  ;;  %v1029_v59 = vpop.eup %1028 }
 0x87b   :  { %v1031_v60 = vpop.eup %1030  ;;  %v414_v61 = vmul.f32 0.5, %v1029_v59 }
 0x87c   :  { %v389_v62 = vmul.f32 0.5, %v1031_v60 }
 0x87d   :  { %v415_v63 = vadd.f32 0.5, %v414_v61 }
 0x87e   :  { %v390_v1 = vadd.f32 0.5, %v389_v62 }
 0x87f   :  { %v417_v5 = vmul.f32 %v415_v63, %v325_v35 }
 0x880   :  { %v392_v7 = vmul.f32 %v390_v1, %v300_v37 }
 0x8eb   :  { %v420_v0 = vpop.permute.xlu1 %419 }
 0x8ec   :  { %v422_v2 = vmul.f32 %v420_v0, %v415_v63  ;;  %v395_v3 = vpop.permute.xlu0 %394 }
 0x8ed   :  { %v397_v4 = vmul.f32 %v395_v3, %v390_v1  ;;  %v614_v3 = vld [vmem:[#allocation3 + $0x28] sm:$0xff] }
 0x8ee   :  { %424 = vrot.lane.b32.xlu1 %v422_v2, %s1145_s20 }
 0x8ef   :  { %399 = vrot.lane.b32.xlu0 %v397_v4, %s1145_s20 }
 0x960   :  { %v425_v6 = vpop.permute.xlu1 %424 }
 0x961   :  { %v427_v8 = vadd.f32 %v425_v6, %v417_v5  ;;  %v400_v9 = vpop.permute.xlu0 %399 }
 0x962   :  { %v402_v10 = vadd.f32 %v400_v9, %v392_v7 }
 0x963   :  { %1032 = vtanh.f32 %v427_v8 }
 0x964   :  { %1034 = vtanh.f32 %v402_v10 }
 0x96d   :  { %v1033_v11 = vpop.eup %1032 }
 0x96e   :  { %v1035_v18 = vpop.eup %1034  ;;  %430 = vrot.lane.b32.xlu1 %v1033_v11, %s1144_s19 }
 0x96f   :  { %405 = vrot.lane.b32.xlu0 %v1035_v18, %s1144_s19 }
 0x9e0   :  { %v431_v22 = vpop.permute.xlu1 %430 }
 0x9e1   :  { %v433_v23 = vmul.f32 %v431_v22, %v415_v63  ;;  %v406_v24 = vpop.permute.xlu0 %405 }
 0x9e2   :  { %v408_v25 = vmul.f32 %v406_v24, %v390_v1 }
 0x9e3   :  { %435 = vrot.lane.b32.xlu0 %v433_v23, %s1145_s20 }
 0x9e4   :  { %439 = vrot.lane.b32.xlu1 %v408_v25, %s1144_s19 }
 0xa55   :  { %v436_v26 = vpop.permute.xlu0 %435 }
 0xa56   :  { %v440_v27 = vpop.permute.xlu1 %439 }
 0xa57   :  { %v442_v29 = vsel %vm94_vm0, %v436_v26, %v440_v27 }
 0xa58   :  { %v443_v30 = vpack.c.bf16 %v442_v29, %v442_v29 }
 0xa5a   :  { %967 = vmatmul.mubr.msk.bf16.vlgmr.msra.gmra.mrb[4].mxu1 %vm137_vm1, %v443_v30 }
 0xa5b   :  { %652 = vmatpush1.bf16.msra.mxu1 %v1212_v13  ;;  %683 = vmatprep.mubr.bf16.mxu1 %v1146_v21 }
 0xa5c   :  { %653 = vmatprep.subr.bf16.mxu1 %v1214_v14 }
 0xa5f   :  { %654 = vmatpush1.bf16.msra.mxu1 %v1219_v15 }
 0xa60   :  { %655 = vmatprep.subr.bf16.mxu1 %v1223_v16 }
 0xa63   :  { %656 = vmatpush1.bf16.msra.mxu1 %v1227_v17 }
 0xa64   :  { %657 = vmatprep.subr.bf16.mxu1 %v1235_v19 }
 0xa67   :  { %658 = vmatpush1.bf16.msra.mxu1 %v1237_v20 }
 0xa68   :  { %855 = vmatprep.subr.bf16.mxu1 %v1210_v12 }
 0xb2d   :  { %v481_v32 = vpop.f32.mrb[4].mxu1 }
 0xb2e   :  { %v513_v33 = vadd.f32 %v512_v31, %v481_v32  ;;  %v483_v34 = vpop.f32.mrb[5].mxu1 }
 0xb2f   :  { %v488_v35 = vadd.f32 %v1262_v28, %v483_v34  ;;  %v485_v36 = vpop.f32.mrb[6].mxu1 }
 0xb30   :  { %1036 = vtanh.f32 %v513_v33  ;;  %v486_v37 = vpop.f32.mrb[7].mxu1  ;;  %v514_v40 = vmul.f32 0.5, %v513_v33 }
 0xb31   :  { %1038 = vtanh.f32 %v488_v35  ;;  %v489_v41 = vmul.f32 0.5, %v488_v35 }
 0xb32   :  { %1040 = vtanh.f32 %v514_v40 }
 0xb33   :  { %1042 = vtanh.f32 %v489_v41 }
 0xb3a   :  { %v1037_v38 = vpop.eup %1036 }
 0xb3b   :  { %v1039_v39 = vpop.eup %1038  ;;  %521 = vrot.lane.b32.xlu1 %v1037_v38, %s1144_s19 }
 0xb3c   :  { %496 = vrot.lane.b32.xlu0 %v1039_v39, %s1144_s19  ;;  %v1041_v12 = vpop.eup %1040 }
 0xb3d   :  { %v1043_v42 = vpop.eup %1042  ;;  %v516_v43 = vmul.f32 0.5, %v1041_v12 }
 0xb3e   :  { %v491_v44 = vmul.f32 0.5, %v1043_v42 }
 0xb3f   :  { %v517_v45 = vadd.f32 0.5, %v516_v43 }
 0xb40   :  { %v492_v47 = vadd.f32 0.5, %v491_v44 }
 0xb41   :  { %v519_v51 = vmul.f32 %v517_v45, %v427_v8 }
 0xb42   :  { %v494_v53 = vmul.f32 %v492_v47, %v402_v10 }
 0xbad   :  { %v522_v46 = vpop.permute.xlu1 %521 }
 0xbae   :  { %v524_v48 = vmul.f32 %v522_v46, %v517_v45  ;;  %v497_v49 = vpop.permute.xlu0 %496 }
 0xbaf   :  { %v499_v50 = vmul.f32 %v497_v49, %v492_v47  ;;  %v716_v49 = vld [vmem:[#allocation3 + $0x30] sm:$0xff] }
 0xbb0   :  { %526 = vrot.lane.b32.xlu1 %v524_v48, %s1145_s20 }
 0xbb1   :  { %501 = vrot.lane.b32.xlu0 %v499_v50, %s1145_s20 }
 0xc22   :  { %v527_v52 = vpop.permute.xlu1 %526 }
 0xc23   :  { %v529_v54 = vadd.f32 %v527_v52, %v519_v51  ;;  %v502_v55 = vpop.permute.xlu0 %501 }
 0xc24   :  { %v504_v56 = vadd.f32 %v502_v55, %v494_v53 }
 0xc25   :  { %1044 = vtanh.f32 %v529_v54 }
 0xc26   :  { %1046 = vtanh.f32 %v504_v56 }
 0xc2f   :  { %v1045_v57 = vpop.eup %1044 }
 0xc30   :  { %v1047_v58 = vpop.eup %1046  ;;  %532 = vrot.lane.b32.xlu1 %v1045_v57, %s1144_s19 }
 0xc31   :  { %507 = vrot.lane.b32.xlu0 %v1047_v58, %s1144_s19 }
 0xca2   :  { %v533_v59 = vpop.permute.xlu1 %532 }
 0xca3   :  { %v535_v60 = vmul.f32 %v533_v59, %v517_v45  ;;  %v508_v61 = vpop.permute.xlu0 %507 }
 0xca4   :  { %v510_v62 = vmul.f32 %v508_v61, %v492_v47 }
 0xca5   :  { %537 = vrot.lane.b32.xlu0 %v535_v60, %s1145_s20 }
 0xca6   :  { %541 = vrot.lane.b32.xlu1 %v510_v62, %s1144_s19 }
 0xd17   :  { %v538_v63 = vpop.permute.xlu0 %537 }
 0xd18   :  { %v542_v0 = vpop.permute.xlu1 %541 }
 0xd19   :  { %v544_v1 = vsel %vm94_vm0, %v538_v63, %v542_v0 }
 0xd1a   :  { %v545_v2 = vpack.c.bf16 %v544_v1, %v544_v1 }
 0xd1c   :  { %968 = vmatmul.mubr.msk.bf16.vlgmr.msra.gmra.mrb[8].mxu0 %vm137_vm1, %v545_v2 }
 0xd1d   :  { %754 = vmatpush1.bf16.msra.mxu0 %v1212_v13  ;;  %785 = vmatprep.mubr.bf16.mxu0 %v1146_v21 }
 0xd1e   :  { %755 = vmatprep.subr.bf16.mxu0 %v1214_v14 }
 0xd21   :  { %756 = vmatpush1.bf16.msra.mxu0 %v1219_v15 }
 0xd22   :  { %757 = vmatprep.subr.bf16.mxu0 %v1223_v16 }
 0xd25   :  { %758 = vmatpush1.bf16.msra.mxu0 %v1227_v17 }
 0xd26   :  { %759 = vmatprep.subr.bf16.mxu0 %v1235_v19 }
 0xd29   :  { %760 = vmatpush1.bf16.msra.mxu0 %v1237_v20 }
 0xdef   :  { %v583_v4 = vpop.f32.mrb[8].mxu0 }
 0xdf0   :  { %v615_v5 = vadd.f32 %v614_v3, %v583_v4  ;;  %v585_v6 = vpop.f32.mrb[9].mxu0 }
 0xdf1   :  { %v590_v7 = vadd.f32 %v1262_v28, %v585_v6  ;;  %v587_v8 = vpop.f32.mrb[10].mxu0 }
 0xdf2   :  { %1048 = vtanh.f32 %v615_v5  ;;  %v588_v9 = vpop.f32.mrb[11].mxu0  ;;  %v616_v18 = vmul.f32 0.5, %v615_v5 }
 0xdf3   :  { %1050 = vtanh.f32 %v590_v7  ;;  %v591_v22 = vmul.f32 0.5, %v590_v7 }
 0xdf4   :  { %1052 = vtanh.f32 %v616_v18 }
 0xdf5   :  { %1054 = vtanh.f32 %v591_v22 }
 0xdfc   :  { %v1049_v10 = vpop.eup %1048 }
 0xdfd   :  { %v1051_v11 = vpop.eup %1050  ;;  %623 = vrot.lane.b32.xlu1 %v1049_v10, %s1144_s19 }
 0xdfe   :  { %598 = vrot.lane.b32.xlu0 %v1051_v11, %s1144_s19  ;;  %v1053_v23 = vpop.eup %1052 }
 0xdff   :  { %v1055_v24 = vpop.eup %1054  ;;  %v618_v25 = vmul.f32 0.5, %v1053_v23  ;;  %v818_v23 = vld [vmem:[#allocation3 + $0x38] sm:$0xff] }
 0xe00   :  { %v593_v26 = vmul.f32 0.5, %v1055_v24 }
 0xe01   :  { %v619_v27 = vadd.f32 0.5, %v618_v25 }
 0xe02   :  { %v594_v30 = vadd.f32 0.5, %v593_v26 }
 0xe03   :  { %v621_v34 = vmul.f32 %v619_v27, %v529_v54 }
 0xe04   :  { %v596_v36 = vmul.f32 %v594_v30, %v504_v56 }
 0xe6f   :  { %v624_v29 = vpop.permute.xlu1 %623 }
 0xe70   :  { %v626_v31 = vmul.f32 %v624_v29, %v619_v27  ;;  %v599_v32 = vpop.permute.xlu0 %598 }
 0xe71   :  { %v601_v33 = vmul.f32 %v599_v32, %v594_v30 }
 0xe72   :  { %628 = vrot.lane.b32.xlu1 %v626_v31, %s1145_s20 }
 0xe73   :  { %603 = vrot.lane.b32.xlu0 %v601_v33, %s1145_s20 }
 0xee4   :  { %v629_v35 = vpop.permute.xlu1 %628 }
 0xee5   :  { %v631_v37 = vadd.f32 %v629_v35, %v621_v34  ;;  %v604_v38 = vpop.permute.xlu0 %603 }
 0xee6   :  { %v606_v39 = vadd.f32 %v604_v38, %v596_v36 }
 0xee7   :  { %1056 = vtanh.f32 %v631_v37 }
 0xee8   :  { %1058 = vtanh.f32 %v606_v39 }
 0xef1   :  { %v1057_v40 = vpop.eup %1056 }
 0xef2   :  { %v1059_v41 = vpop.eup %1058  ;;  %634 = vrot.lane.b32.xlu1 %v1057_v40, %s1144_s19 }
 0xef3   :  { %609 = vrot.lane.b32.xlu0 %v1059_v41, %s1144_s19 }
 0xf64   :  { %v635_v12 = vpop.permute.xlu1 %634 }
 0xf65   :  { %v637_v42 = vmul.f32 %v635_v12, %v619_v27  ;;  %v610_v43 = vpop.permute.xlu0 %609 }
 0xf66   :  { %v612_v44 = vmul.f32 %v610_v43, %v594_v30 }
 0xf67   :  { %639 = vrot.lane.b32.xlu0 %v637_v42, %s1145_s20 }
 0xf68   :  { %643 = vrot.lane.b32.xlu1 %v612_v44, %s1144_s19 }
 0xfd9   :  { %v640_v45 = vpop.permute.xlu0 %639 }
 0xfda   :  { %v644_v46 = vpop.permute.xlu1 %643 }
 0xfdb   :  { %v646_v47 = vsel %vm94_vm0, %v640_v45, %v644_v46 }
 0xfdc   :  { %v647_v48 = vpack.c.bf16 %v646_v47, %v646_v47 }
 0xfde   :  { %969 = vmatmul.mubr.msk.bf16.vlgmr.msra.gmra.mrb[8].mxu1 %vm137_vm1, %v647_v48 }
 0xfdf   :  { %856 = vmatpush1.bf16.msra.mxu1 %v1212_v13  ;;  %887 = vmatprep.mubr.bf16.mxu1 %v1146_v21 }
 0xfe0   :  { %857 = vmatprep.subr.bf16.mxu1 %v1214_v14 }
 0xfe3   :  { %858 = vmatpush1.bf16.msra.mxu1 %v1219_v15 }
 0xfe4   :  { %859 = vmatprep.subr.bf16.mxu1 %v1223_v16 }
 0xfe7   :  { %860 = vmatpush1.bf16.msra.mxu1 %v1227_v17 }
 0xfe8   :  { %861 = vmatprep.subr.bf16.mxu1 %v1235_v19 }
 0xfeb   :  { %862 = vmatpush1.bf16.msra.mxu1 %v1237_v20 }
0x10b1   :  { %v685_v50 = vpop.f32.mrb[8].mxu1 }
0x10b2   :  { %v717_v51 = vadd.f32 %v716_v49, %v685_v50  ;;  %v687_v52 = vpop.f32.mrb[9].mxu1 }
0x10b3   :  { %v692_v13 = vadd.f32 %v1262_v28, %v687_v52  ;;  %v689_v53 = vpop.f32.mrb[10].mxu1 }
0x10b4   :  { %1060 = vtanh.f32 %v717_v51  ;;  %v690_v21 = vpop.f32.mrb[11].mxu1  ;;  %v718_v16 = vmul.f32 0.5, %v717_v51 }
0x10b5   :  { %1062 = vtanh.f32 %v692_v13  ;;  %v693_v17 = vmul.f32 0.5, %v692_v13 }
0x10b6   :  { %1064 = vtanh.f32 %v718_v16 }
0x10b7   :  { %1066 = vtanh.f32 %v693_v17 }
0x10be   :  { %v1061_v14 = vpop.eup %1060 }
0x10bf   :  { %v1063_v15 = vpop.eup %1062  ;;  %725 = vrot.lane.b32.xlu1 %v1061_v14, %s1144_s19 }
0x10c0   :  { %700 = vrot.lane.b32.xlu0 %v1063_v15, %s1144_s19  ;;  %v1065_v19 = vpop.eup %1064 }
0x10c1   :  { %v1067_v20 = vpop.eup %1066  ;;  %v720_v54 = vmul.f32 0.5, %v1065_v19 }
0x10c2   :  { %v695_v55 = vmul.f32 0.5, %v1067_v20 }
0x10c3   :  { %v721_v56 = vadd.f32 0.5, %v720_v54 }
0x10c4   :  { %v696_v58 = vadd.f32 0.5, %v695_v55 }
0x10c5   :  { %v723_v62 = vmul.f32 %v721_v56, %v631_v37 }
0x10c6   :  { %v698_v0 = vmul.f32 %v696_v58, %v606_v39 }
0x1131   :  { %v726_v57 = vpop.permute.xlu1 %725 }
0x1132   :  { %v728_v59 = vmul.f32 %v726_v57, %v721_v56  ;;  %v701_v60 = vpop.permute.xlu0 %700 }
0x1133   :  { %v703_v61 = vmul.f32 %v701_v60, %v696_v58 }
0x1134   :  { %730 = vrot.lane.b32.xlu1 %v728_v59, %s1145_s20 }
0x1135   :  { %705 = vrot.lane.b32.xlu0 %v703_v61, %s1145_s20 }
0x11a6   :  { %v731_v63 = vpop.permute.xlu1 %730 }
0x11a7   :  { %v733_v1 = vadd.f32 %v731_v63, %v723_v62  ;;  %v706_v2 = vpop.permute.xlu0 %705 }
0x11a8   :  { %v708_v3 = vadd.f32 %v706_v2, %v698_v0  ;;  %v972_v0 = vld [vmem:[%s1400_s3] ss:$0 sm:$0xff] }
0x11a9   :  { %1068 = vtanh.f32 %v733_v1 }
0x11aa   :  { %1070 = vtanh.f32 %v708_v3 }
0x11b3   :  { %v1069_v4 = vpop.eup %1068 }
0x11b4   :  { %v1071_v5 = vpop.eup %1070  ;;  %736 = vrot.lane.b32.xlu1 %v1069_v4, %s1144_s19 }
0x11b5   :  { %711 = vrot.lane.b32.xlu0 %v1071_v5, %s1144_s19 }
0x1226   :  { %v737_v6 = vpop.permute.xlu1 %736 }
0x1227   :  { %v739_v7 = vmul.f32 %v737_v6, %v721_v56  ;;  %v712_v8 = vpop.permute.xlu0 %711 }
0x1228   :  { %v714_v9 = vmul.f32 %v712_v8, %v696_v58 }
0x1229   :  { %741 = vrot.lane.b32.xlu0 %v739_v7, %s1145_s20 }
0x122a   :  { %745 = vrot.lane.b32.xlu1 %v714_v9, %s1144_s19 }
0x129b   :  { %v742_v10 = vpop.permute.xlu0 %741 }
0x129c   :  { %v746_v11 = vpop.permute.xlu1 %745 }
0x129d   :  { %v748_v18 = vsel %vm94_vm0, %v742_v10, %v746_v11  ;;  %v973_v10 = vld [vmem:[#allocation2] ss:$0 sm:$0xff] }
0x129e   :  { %v749_v22 = vpack.c.bf16 %v748_v18, %v748_v18 }
0x12a0   :  { %970 = vmatmul.mubr.msk.bf16.vlgmr.msra.gmra.mrb[12].mxu0 %vm137_vm1, %v749_v22 }
0x1373   :  { %v787_v24 = vpop.f32.mrb[12].mxu0 }
0x1374   :  { %v819_v25 = vadd.f32 %v818_v23, %v787_v24  ;;  %v789_v26 = vpop.f32.mrb[13].mxu0 }
0x1375   :  { %v794_v27 = vadd.f32 %v1262_v28, %v789_v26  ;;  %v791_v29 = vpop.f32.mrb[14].mxu0 }
0x1376   :  { %1072 = vtanh.f32 %v819_v25  ;;  %v792_v30 = vpop.f32.mrb[15].mxu0  ;;  %v820_v33 = vmul.f32 0.5, %v819_v25 }
0x1377   :  { %1074 = vtanh.f32 %v794_v27  ;;  %v795_v34 = vmul.f32 0.5, %v794_v27 }
0x1378   :  { %1076 = vtanh.f32 %v820_v33 }
0x1379   :  { %1078 = vtanh.f32 %v795_v34 }
0x1380   :  { %v1073_v31 = vpop.eup %1072 }
0x1381   :  { %v1075_v32 = vpop.eup %1074  ;;  %827 = vrot.lane.b32.xlu1 %v1073_v31, %s1144_s19 }
0x1382   :  { %802 = vrot.lane.b32.xlu0 %v1075_v32, %s1144_s19  ;;  %v1077_v35 = vpop.eup %1076 }
0x1383   :  { %v1079_v36 = vpop.eup %1078  ;;  %v822_v37 = vmul.f32 0.5, %v1077_v35 }
0x1384   :  { %v797_v38 = vmul.f32 0.5, %v1079_v36 }
0x1385   :  { %v823_v39 = vadd.f32 0.5, %v822_v37 }
0x1386   :  { %v798_v41 = vadd.f32 0.5, %v797_v38 }
0x1387   :  { %v825_v44 = vmul.f32 %v823_v39, %v733_v1 }
0x1388   :  { %v800_v46 = vmul.f32 %v798_v41, %v708_v3 }
0x13f3   :  { %v828_v40 = vpop.permute.xlu1 %827 }
0x13f4   :  { %v830_v12 = vmul.f32 %v828_v40, %v823_v39  ;;  %v803_v42 = vpop.permute.xlu0 %802 }
0x13f5   :  { %v805_v43 = vmul.f32 %v803_v42, %v798_v41 }
0x13f6   :  { %832 = vrot.lane.b32.xlu1 %v830_v12, %s1145_s20 }
0x13f7   :  { %807 = vrot.lane.b32.xlu0 %v805_v43, %s1145_s20 }
0x1468   :  { %v833_v45 = vpop.permute.xlu1 %832 }
0x1469   :  { %v835_v47 = vadd.f32 %v833_v45, %v825_v44  ;;  %v808_v48 = vpop.permute.xlu0 %807 }
0x146a   :  { %v810_v49 = vadd.f32 %v808_v48, %v800_v46 }
0x146b   :  { %1080 = vtanh.f32 %v835_v47 }
0x146c   :  { %1082 = vtanh.f32 %v810_v49 }
0x1475   :  { %v1081_v50 = vpop.eup %1080 }
0x1476   :  { %v1083_v51 = vpop.eup %1082  ;;  %838 = vrot.lane.b32.xlu1 %v1081_v50, %s1144_s19 }
0x1477   :  { %813 = vrot.lane.b32.xlu0 %v1083_v51, %s1144_s19 }
0x14e8   :  { %v839_v52 = vpop.permute.xlu1 %838 }
0x14e9   :  { %v841_v13 = vmul.f32 %v839_v52, %v823_v39  ;;  %v814_v53 = vpop.permute.xlu0 %813 }
0x14ea   :  { %v816_v21 = vmul.f32 %v814_v53, %v798_v41 }
0x14eb   :  { %843 = vrot.lane.b32.xlu0 %v841_v13, %s1145_s20 }
0x14ec   :  { %847 = vrot.lane.b32.xlu1 %v816_v21, %s1144_s19 }
0x155d   :  { %v844_v14 = vpop.permute.xlu0 %843 }
0x155e   :  { %v848_v15 = vpop.permute.xlu1 %847 }
0x155f   :  { %v850_v16 = vsel %vm94_vm0, %v844_v14, %v848_v15 }
0x1560   :  { %v851_v17 = vpack.c.bf16 %v850_v16, %v850_v16 }
0x1562   :  { %971 = vmatmul.mubr.msk.bf16.vlgmr.msra.gmra.mrb[12].mxu1 %vm137_vm1, %v851_v17 }
0x1635   :  { %v889_v19 = vpop.f32.mrb[12].mxu1 }
0x1636   :  { %v890_v20 = vpop.f32.mrb[13].mxu1 }
0x1637   :  { %v895_v54 = vadd.f32 %v1262_v28, %v890_v20  ;;  %v892_v55 = vpop.f32.mrb[14].mxu1 }
0x1638   :  { %v893_v56 = vpop.f32.mrb[15].mxu1 }
0x1639   :  { %1084 = vtanh.f32 %v895_v54  ;;  %v896_v58 = vmul.f32 0.5, %v895_v54 }
0x163b   :  { %1086 = vtanh.f32 %v896_v58 }
0x1643   :  { %v1085_v57 = vpop.eup %1084 }
0x1644   :  { %903 = vrot.lane.b32.xlu0 %v1085_v57, %s1144_s19 }
0x1645   :  { %v1087_v59 = vpop.eup %1086 }
0x1646   :  { %v898_v60 = vmul.f32 0.5, %v1087_v59 }
0x1648   :  { %v899_v61 = vadd.f32 0.5, %v898_v60 }
0x164a   :  { %v901_v28 = vmul.f32 %v899_v61, %v810_v49 }
0x16b6   :  { %v904_v62 = vpop.permute.xlu0 %903 }
0x16b7   :  { %v906_v63 = vmul.f32 %v904_v62, %v899_v61 }
0x16b9   :  { %908 = vrot.lane.b32.xlu1 %v906_v63, %s1145_s20 }
0x16bd   :  { %924 = vrot.lane.b32.xlu1 %v972_v0, %s1147_s23 }
0x172b   :  { %v909_v1 = vpop.permute.xlu1 %908 }
0x172c   :  { %v911_v2 = vadd.f32 %v909_v1, %v901_v28 }
0x172e   :  { %1088 = vtanh.f32 %v911_v2 }
0x172f   :  { %v925_v5 = vpop.permute.xlu1 %924 }
0x1738   :  { %v1089_v3 = vpop.eup %1088 }
0x1739   :  { %914 = vrot.lane.b32.xlu0 %v1089_v3, %s1144_s19 }
0x17ab   :  { %v915_v4 = vpop.permute.xlu0 %914 }
0x17ac   :  { %v917_v6 = vmul.f32 %v915_v4, %v899_v61 }
0x17ae   :  { %v927_v7 = vmul.f32 %v925_v5, %v917_v6 }
0x17b0   :  { %929 = vrot.lane.b32.xlu0 %v927_v7, %s1145_s20 }
0x1822   :  { %v930_v8 = vpop.permute.xlu0 %929 }
0x1823   :  { %v932_v9 = vsel %vm94_vm0, %v930_v8, 0.0 }
0x1824   :  { %933 = vadd.xlane.f32.xlu1 %v932_v9 }
0x18b1   :  { %v934_v11 = vpop.xlane.xlu1 %933 }
0x18b2   :  { %v942_v18 = vadd.f32 %v973_v10, %v934_v11 }
0x18b4   :  { %v943_v22 = vmul.f32 0.5, %v942_v18 }
0x18b6   :  { %1090 = vtanh.f32 %v943_v22 }
0x18c0   :  { %v1091_v23 = vpop.eup %1090 }
0x18c1   :  { %v945_v24 = vmul.f32 0.5, %v1091_v23 }
0x18c3   :  { %v946_v25 = vadd.f32 0.5, %v945_v24 }
0x18c5   :  { %948 = vst.msk [vmem:[%s1402_s5] sm:$0xff] %vm947_vm2, %v946_v25 }
0x18c6   :  { %953 = vsyncpa [#allocation4], 1 }
0x18c7   :  { %954 = vsyncpa [#allocation6], 1 }

</bundles_post_ra>
